<compile_context>
chip_gen: v6e
topology: v6e:2x2x1
jax: 0.10.0
libtpu: 0.0.40
codegen_flags: <defaults>
</compile_context>

<pallas_src>
import functools

import jax
import jax.numpy as jnp
from jax.experimental import pallas as pl
from jax.experimental.pallas import tpu as pltpu


def _round_up(x, m):
    return (x + m - 1) // m * m


# ---------------------------------------------------------------------------
# Counter-based PRNG (pure jnp int32 ops -> lowers on TPU *and* interpret mode)
# ---------------------------------------------------------------------------

def _srl(x, n):
    """Logical right shift for int32 (arithmetic shift + mask)."""
    return (x >> n) & ((1 << (32 - n)) - 1)


def _hash32(x):
    """murmur3-style 32-bit finalizer; int32 with wrapping arithmetic."""
    x = x ^ _srl(x, 16)
    x = x * (-2048144789)          # 0x85EBCA6B
    x = x ^ _srl(x, 13)
    x = x * (-1028477387)          # 0xC2B2AE35
    x = x ^ _srl(x, 16)
    return x


def _mix(*vals):
    """Hash a tuple of scalars (seed, tile, step, stream) into one int32 salt."""
    acc = jnp.int32(0)
    for v in vals:
        acc = _hash32(acc * (-1640531527) + jnp.asarray(v, jnp.int32))   # 0x9E3779B9
    return acc


def _std_normal(shape, salt1, salt2):
    """Standard-normal draw via per-element counter hash + Box-Muller."""
    rows = jax.lax.broadcasted_iota(jnp.int32, shape, 0)
    cols = jax.lax.broadcasted_iota(jnp.int32, shape, 1)
    idx = rows * shape[1] + cols
    b1 = _hash32(idx ^ salt1)
    b2 = _hash32(idx ^ salt2)
    u1 = _srl(b1, 9).astype(jnp.float32) * (1.0 / (1 << 23))   # [0, 1)
    u2 = _srl(b2, 9).astype(jnp.float32) * (1.0 / (1 << 23))   # [0, 1)
    rad = jnp.sqrt(-2.0 * jnp.log(1.0 - u1))                   # 1-u1 in (0, 1]
    return rad * jnp.cos(6.283185307179586 * u2)


# ---------------------------------------------------------------------------
# Kernel: grid = (position_tile,) [parallel]; T runs as an in-kernel fori_loop.
# ---------------------------------------------------------------------------

def _diffusion_kernel(num_timesteps, coef_ref, seed_ref, cond_ref,
                      w1x_ref, w1c_ref, w1n_ref, b1_ref, w2_ref, b2_ref,
                      out_ref):
    T = num_timesteps
    m = pl.program_id(0)
    seed = seed_ref[0]

    w1x = w1x_ref[...]             # (H, Cg) bf16
    w2 = w2_ref[...]               # (Cg, H) bf16
    w1n = w1n_ref[...]             # (H, 1)  f32
    b1 = b1_ref[...]               # (H, 1)  f32
    b2 = b2_ref[...]               # (Cg, 1) f32

    # Condition projection is constant over timesteps: compute once per tile.
    cproj = jnp.dot(w1c_ref[...], cond_ref[...],
                    preferred_element_type=jnp.float32)        # (H, tm) f32

    def denoise(x, noise_level):
        # TODO(synk): synthetic pointwise 2-layer MLP stands in for the injected
        # denoiser `model` (not defined in the reference file).
        h = (jnp.dot(w1x, x.astype(jnp.bfloat16),
                     preferred_element_type=jnp.float32)
             + cproj + (noise_level * w1n + b1))
        h = jnp.maximum(h, 0.0)
        return (jnp.dot(w2, h.astype(jnp.bfloat16),
                        preferred_element_type=jnp.float32) + b2)

    # x_T ~ N(0, I) for this tile, generated in-kernel (no HBM noise stream).
    x = _std_normal(out_ref.shape, _mix(seed, m, -1, 0), _mix(seed, m, -1, 1))

    def step(s, x):
        # Loop step s corresponds to timestep i = T - 1 - s (coefs pre-reversed).
        nl = coef_ref[4 * s + 0]   # sqrt(alphas_cumprod[i])  (noise_level)
        ra = coef_ref[4 * s + 1]   # 1 / sqrt(alpha_i)
        cz = coef_ref[4 * s + 2]   # beta_i / sqrt(1 - alphas_cumprod[i])
        sg = coef_ref[4 * s + 3]   # sigma_i
        z = denoise(x, nl)
        eps = _std_normal(x.shape, _mix(seed, m, s, 2), _mix(seed, m, s, 3))
        return ra * (x - cz * z) + sg * eps

    # All reverse steps except the last add sampler noise.
    x = jax.lax.fori_loop(0, T - 1, step, x)

    # Final reverse step (timestep i == 0): sigma == 0, skip the Gaussian draw.
    s_last = T - 1
    z = denoise(x, coef_ref[4 * s_last + 0])
    x = coef_ref[4 * s_last + 1] * (x - coef_ref[4 * s_last + 2] * z)

    # output_T on the way out.
    out_ref[...] = (x + 1.0) * 0.5


def init_params(key, generated_channels, condition_channels, hidden):
    k1, k2, k3, k4, k5, k6 = jax.random.split(key, 6)
    scale = 0.2
    Cg, Cc, H = generated_channels, condition_channels, hidden
    # Channels-on-sublane layout: layer-1 weights are (H, Cin), layer-2 is (Cg, H).
    return {
        "w1x": scale * jax.random.normal(k1, (H, Cg), jnp.float32),
        "w1c": scale * jax.random.normal(k2, (H, Cc), jnp.float32),
        "w1n": scale * jax.random.normal(k3, (H, 1), jnp.float32),
        "b1":  scale * jax.random.normal(k4, (H, 1), jnp.float32),
        "w2":  scale * jax.random.normal(k5, (Cg, H), jnp.float32),
        "b2":  scale * jax.random.normal(k6, (Cg, 1), jnp.float32),
    }


@functools.partial(jax.jit,
                   static_argnames=("num_timesteps", "beta_start", "beta_end", "tile_m"))
def conditional_diffusion_forward(condition_ncl, params, seed,
                                  num_timesteps=8, beta_start=1e-6, beta_end=0.006,
                                  tile_m=8192):
    """Full inference cycle. condition_ncl: (B, Cc, L) like PyTorch; returns (B, Cg, L)."""
    T = int(num_timesteps)
    assert T >= 1, "num_timesteps must be >= 1"
    B, Cc, L = condition_ncl.shape
    H, Cg = params["w1x"].shape

    # input_T hoisted out of the T loop; channels on sublanes, B*L positions on lanes.
    cond = jnp.clip(condition_ncl.astype(jnp.float32), 0.0, 1.0) * 2.0 - 1.0
    cond_cm = jnp.transpose(cond, (1, 0, 2)).reshape(Cc, B * L)

    M = B * L
    m128 = _round_up(max(M, 1), 128)
    if m128 <= 128:
        tm = m128
    else:
        # At least 2 tiles so the "parallel" grid axis shards across both v7x TCs;
        # cap at tile_m to amortize per-grid-step overhead while staying VMEM-light.
        tm = min(tile_m, _round_up((m128 + 1) // 2, 128))
    M_pad = _round_up(M, tm)
    n_tiles = M_pad // tm

    # Padded tail positions carry condition 0 (post-input_T) and random x_T; they
    # are sliced off below and never reduced over inside the kernel.
    cond_cm = jnp.pad(cond_cm, ((0, 0), (0, M_pad - M))).astype(jnp.bfloat16)

    # GaussianForward linear schedule + DDPM sampler coefficients, reversed so loop
    # step s corresponds to timestep i = T - 1 - s; flattened to (4*T,) for SMEM.
    betas = jnp.linspace(beta_start, beta_end, T, dtype=jnp.float32)
    alphas = 1.0 - betas
    acp = jnp.cumprod(alphas)
    acp_prev = jnp.concatenate([jnp.ones((1,), jnp.float32), acp[:-1]])
    sqrt_acp = jnp.sqrt(acp)                               # alphas_cumprod_sqrt
    recip_sqrt_alpha = 1.0 / jnp.sqrt(alphas)
    coef_z = betas / jnp.sqrt(1.0 - acp)
    post_var = betas * (1.0 - acp_prev) / (1.0 - acp)
    # TODO(synk): nilmtk's DDPM_Sampler may use sqrt(beta_t) instead of the posterior
    # variance; the denoiser is synthetic anyway, so numerics won't match PyTorch.
    sigma = jnp.sqrt(jnp.maximum(post_var, 0.0))
    sigma = sigma.at[0].set(0.0)                           # no noise at i == 0
    rev = lambda a: a[::-1]
    coef = jnp.stack([rev(sqrt_acp), rev(recip_sqrt_alpha), rev(coef_z), rev(sigma)],
                     axis=1).reshape(-1).astype(jnp.float32)        # (4*T,)

    seed_arr = jnp.asarray(seed, jnp.int32).reshape(1)

    # bf16 weights/activations for the MXU; bias/elementwise math stays f32.
    w1x = params["w1x"].astype(jnp.bfloat16)
    w1c = params["w1c"].astype(jnp.bfloat16)
    w2 = params["w2"].astype(jnp.bfloat16)
    w1n = params["w1n"].astype(jnp.float32)
    b1 = params["b1"].astype(jnp.float32)
    b2 = params["b2"].astype(jnp.float32)

    smem_spec = pl.BlockSpec(memory_space=pltpu.MemorySpace.SMEM)

    grid_spec = pltpu.PrefetchScalarGridSpec(
        num_scalar_prefetch=0,
        grid=(n_tiles,),                                   # T handled inside the kernel
        in_specs=[
            smem_spec,                                     # coef (4*T,) f32 in SMEM
            smem_spec,                                     # seed (1,)   i32 in SMEM
            pl.BlockSpec((Cc, tm), lambda m: (0, m)),      # condition tile (bf16)
            pl.BlockSpec((H, Cg), lambda m: (0, 0)),       # w1x
            pl.BlockSpec((H, Cc), lambda m: (0, 0)),       # w1c
            pl.BlockSpec((H, 1), lambda m: (0, 0)),        # w1n
            pl.BlockSpec((H, 1), lambda m: (0, 0)),        # b1
            pl.BlockSpec((Cg, H), lambda m: (0, 0)),       # w2
            pl.BlockSpec((Cg, 1), lambda m: (0, 0)),       # b2
        ],
        out_specs=pl.BlockSpec((Cg, tm), lambda m: (0, m)),
    )

    out_cm = pl.pallas_call(
        functools.partial(_diffusion_kernel, T),
        out_shape=jax.ShapeDtypeStruct((Cg, M_pad), jnp.float32),
        grid_spec=grid_spec,
        compiler_params=pltpu.CompilerParams(
            dimension_semantics=("parallel",),
        ),
    )(coef, seed_arr, cond_cm, w1x, w1c, w1n, b1, w2, b2)

    out = out_cm[:, :M].reshape(Cg, B, L)
    return jnp.transpose(out, (1, 0, 2))                   # back to (B, Cg, L)


if __name__ == "__main__":
    key = jax.random.PRNGKey(0)
    kc, kp = jax.random.split(key, 2)

    B, Cc, Cg, L, H, T = 2, 3, 3, 16, 32, 8   # small demo shapes (module default T=1000)

    condition = jax.random.uniform(kc, (B, Cc, L), jnp.float32)   # PyTorch NCL layout
    params = init_params(kp, generated_channels=Cg, condition_channels=Cc, hidden=H)

    out = conditional_diffusion_forward(condition, params, seed=0, num_timesteps=T)
    out = jax.block_until_ready(out)

    assert out.shape == (B, Cg, L)
    assert bool(jnp.all(jnp.isfinite(out)))
    print("KERNEL_OK")
</pallas_src>

<mosaic_0001>
module attributes {stable_mosaic.version = 11 : i64} {
  func.func @_diffusion_kernel(%arg0: i32, %arg1: memref<32xf32, #tpu.memory_space<smem>>, %arg2: memref<1xi32, #tpu.memory_space<smem>>, %arg3: memref<3x128xbf16, #tpu.memory_space<vmem>>, %arg4: memref<32x3xbf16, #tpu.memory_space<vmem>>, %arg5: memref<32x3xbf16, #tpu.memory_space<vmem>>, %arg6: memref<32x1xf32, #tpu.memory_space<vmem>>, %arg7: memref<32x1xf32, #tpu.memory_space<vmem>>, %arg8: memref<3x32xbf16, #tpu.memory_space<vmem>>, %arg9: memref<3x1xf32, #tpu.memory_space<vmem>>, %arg10: memref<3x128xf32, #tpu.memory_space<vmem>>) attributes {dimension_semantics = [#tpu.dimension_semantics<parallel>], iteration_bounds = array<i64: 1>, scalar_prefetch = 0 : i64, scratch_operands = 0 : i64, tpu.core_type = #tpu.core_type<tc>, window_params = [{transform_indices = @transform_0, window_bounds = array<i64: 32>}, {transform_indices = @transform_1, window_bounds = array<i64: 1>}, {transform_indices = @transform_2, window_bounds = array<i64: 3, 128>}, {pipeline_mode = #tpu.pipeline_mode<synchronous>, transform_indices = @transform_3, window_bounds = array<i64: 32, 3>}, {pipeline_mode = #tpu.pipeline_mode<synchronous>, transform_indices = @transform_4, window_bounds = array<i64: 32, 3>}, {pipeline_mode = #tpu.pipeline_mode<synchronous>, transform_indices = @transform_5, window_bounds = array<i64: 32, 1>}, {pipeline_mode = #tpu.pipeline_mode<synchronous>, transform_indices = @transform_6, window_bounds = array<i64: 32, 1>}, {pipeline_mode = #tpu.pipeline_mode<synchronous>, transform_indices = @transform_7, window_bounds = array<i64: 3, 32>}, {pipeline_mode = #tpu.pipeline_mode<synchronous>, transform_indices = @transform_8, window_bounds = array<i64: 3, 1>}, {transform_indices = @transform_9, window_bounds = array<i64: 3, 128>}]} {
    %c0 = arith.constant 0 : index
    %0 = memref.load %arg2[%c0] : memref<1xi32, #tpu.memory_space<smem>>
    %c0_0 = arith.constant 0 : index
    %c0_1 = arith.constant 0 : index
    %1 = vector.load %arg4[%c0_0, %c0_1] : memref<32x3xbf16, #tpu.memory_space<vmem>>, vector<32x3xbf16>
    %c0_2 = arith.constant 0 : index
    %c0_3 = arith.constant 0 : index
    %2 = vector.load %arg8[%c0_2, %c0_3] : memref<3x32xbf16, #tpu.memory_space<vmem>>, vector<3x32xbf16>
    %c0_4 = arith.constant 0 : index
    %c0_5 = arith.constant 0 : index
    %3 = vector.load %arg6[%c0_4, %c0_5] : memref<32x1xf32, #tpu.memory_space<vmem>>, vector<32x1xf32>
    %c0_6 = arith.constant 0 : index
    %c0_7 = arith.constant 0 : index
    %4 = vector.load %arg7[%c0_6, %c0_7] : memref<32x1xf32, #tpu.memory_space<vmem>>, vector<32x1xf32>
    %c0_8 = arith.constant 0 : index
    %c0_9 = arith.constant 0 : index
    %5 = vector.load %arg9[%c0_8, %c0_9] : memref<3x1xf32, #tpu.memory_space<vmem>>, vector<3x1xf32>
    %c0_10 = arith.constant 0 : index
    %c0_11 = arith.constant 0 : index
    %6 = vector.load %arg5[%c0_10, %c0_11] : memref<32x3xbf16, #tpu.memory_space<vmem>>, vector<32x3xbf16>
    %c0_12 = arith.constant 0 : index
    %c0_13 = arith.constant 0 : index
    %7 = vector.load %arg3[%c0_12, %c0_13] : memref<3x128xbf16, #tpu.memory_space<vmem>>, vector<3x128xbf16>
    %cst = arith.constant dense<0.000000e+00> : vector<32x128xf32>
    %8 = tpu.matmul %6, %7, %cst {dimension_numbers = #tpu.dot_dimension_numbers<[1], [0], [0], [1], [0, 0, 1, 1], [], []>} : vector<32x3xbf16>, vector<3x128xbf16>, vector<32x128xf32> -> vector<32x128xf32>
    %c0_i32 = arith.constant 0 : i32
    %c-1640531527_i32 = arith.constant -1640531527 : i32
    %9 = arith.muli %c0_i32, %c-1640531527_i32 : i32
    %10 = arith.addi %9, %0 : i32
    %c16_i32 = arith.constant 16 : i32
    %11 = arith.shrsi %10, %c16_i32 : i32
    %c65535_i32 = arith.constant 65535 : i32
    %12 = arith.andi %11, %c65535_i32 : i32
    %13 = arith.xori %10, %12 : i32
    %c-2048144789_i32 = arith.constant -2048144789 : i32
    %14 = arith.muli %13, %c-2048144789_i32 : i32
    %c13_i32 = arith.constant 13 : i32
    %15 = arith.shrsi %14, %c13_i32 : i32
    %c524287_i32 = arith.constant 524287 : i32
    %16 = arith.andi %15, %c524287_i32 : i32
    %17 = arith.xori %14, %16 : i32
    %c-1028477387_i32 = arith.constant -1028477387 : i32
    %18 = arith.muli %17, %c-1028477387_i32 : i32
    %c16_i32_14 = arith.constant 16 : i32
    %19 = arith.shrsi %18, %c16_i32_14 : i32
    %c65535_i32_15 = arith.constant 65535 : i32
    %20 = arith.andi %19, %c65535_i32_15 : i32
    %21 = arith.xori %18, %20 : i32
    %c-1640531527_i32_16 = arith.constant -1640531527 : i32
    %22 = arith.muli %21, %c-1640531527_i32_16 : i32
    %23 = arith.addi %22, %arg0 : i32
    %c16_i32_17 = arith.constant 16 : i32
    %24 = arith.shrsi %23, %c16_i32_17 : i32
    %c65535_i32_18 = arith.constant 65535 : i32
    %25 = arith.andi %24, %c65535_i32_18 : i32
    %26 = arith.xori %23, %25 : i32
    %c-2048144789_i32_19 = arith.constant -2048144789 : i32
    %27 = arith.muli %26, %c-2048144789_i32_19 : i32
    %c13_i32_20 = arith.constant 13 : i32
    %28 = arith.shrsi %27, %c13_i32_20 : i32
    %c524287_i32_21 = arith.constant 524287 : i32
    %29 = arith.andi %28, %c524287_i32_21 : i32
    %30 = arith.xori %27, %29 : i32
    %c-1028477387_i32_22 = arith.constant -1028477387 : i32
    %31 = arith.muli %30, %c-1028477387_i32_22 : i32
    %c16_i32_23 = arith.constant 16 : i32
    %32 = arith.shrsi %31, %c16_i32_23 : i32
    %c65535_i32_24 = arith.constant 65535 : i32
    %33 = arith.andi %32, %c65535_i32_24 : i32
    %34 = arith.xori %31, %33 : i32
    %c-1640531527_i32_25 = arith.constant -1640531527 : i32
    %35 = arith.muli %34, %c-1640531527_i32_25 : i32
    %c-1_i32 = arith.constant -1 : i32
    %36 = arith.addi %35, %c-1_i32 : i32
    %c16_i32_26 = arith.constant 16 : i32
    %37 = arith.shrsi %36, %c16_i32_26 : i32
    %c65535_i32_27 = arith.constant 65535 : i32
    %38 = arith.andi %37, %c65535_i32_27 : i32
    %39 = arith.xori %36, %38 : i32
    %c-2048144789_i32_28 = arith.constant -2048144789 : i32
    %40 = arith.muli %39, %c-2048144789_i32_28 : i32
    %c13_i32_29 = arith.constant 13 : i32
    %41 = arith.shrsi %40, %c13_i32_29 : i32
    %c524287_i32_30 = arith.constant 524287 : i32
    %42 = arith.andi %41, %c524287_i32_30 : i32
    %43 = arith.xori %40, %42 : i32
    %c-1028477387_i32_31 = arith.constant -1028477387 : i32
    %44 = arith.muli %43, %c-1028477387_i32_31 : i32
    %c16_i32_32 = arith.constant 16 : i32
    %45 = arith.shrsi %44, %c16_i32_32 : i32
    %c65535_i32_33 = arith.constant 65535 : i32
    %46 = arith.andi %45, %c65535_i32_33 : i32
    %47 = arith.xori %44, %46 : i32
    %c-1640531527_i32_34 = arith.constant -1640531527 : i32
    %48 = arith.muli %47, %c-1640531527_i32_34 : i32
    %c0_i32_35 = arith.constant 0 : i32
    %49 = arith.addi %48, %c0_i32_35 : i32
    %c16_i32_36 = arith.constant 16 : i32
    %50 = arith.shrsi %49, %c16_i32_36 : i32
    %c65535_i32_37 = arith.constant 65535 : i32
    %51 = arith.andi %50, %c65535_i32_37 : i32
    %52 = arith.xori %49, %51 : i32
    %c-2048144789_i32_38 = arith.constant -2048144789 : i32
    %53 = arith.muli %52, %c-2048144789_i32_38 : i32
    %c13_i32_39 = arith.constant 13 : i32
    %54 = arith.shrsi %53, %c13_i32_39 : i32
    %c524287_i32_40 = arith.constant 524287 : i32
    %55 = arith.andi %54, %c524287_i32_40 : i32
    %56 = arith.xori %53, %55 : i32
    %c-1028477387_i32_41 = arith.constant -1028477387 : i32
    %57 = arith.muli %56, %c-1028477387_i32_41 : i32
    %c16_i32_42 = arith.constant 16 : i32
    %58 = arith.shrsi %57, %c16_i32_42 : i32
    %c65535_i32_43 = arith.constant 65535 : i32
    %59 = arith.andi %58, %c65535_i32_43 : i32
    %60 = arith.xori %57, %59 : i32
    %c0_i32_44 = arith.constant 0 : i32
    %c-1640531527_i32_45 = arith.constant -1640531527 : i32
    %61 = arith.muli %c0_i32_44, %c-1640531527_i32_45 : i32
    %62 = arith.addi %61, %0 : i32
    %c16_i32_46 = arith.constant 16 : i32
    %63 = arith.shrsi %62, %c16_i32_46 : i32
    %c65535_i32_47 = arith.constant 65535 : i32
    %64 = arith.andi %63, %c65535_i32_47 : i32
    %65 = arith.xori %62, %64 : i32
    %c-2048144789_i32_48 = arith.constant -2048144789 : i32
    %66 = arith.muli %65, %c-2048144789_i32_48 : i32
    %c13_i32_49 = arith.constant 13 : i32
    %67 = arith.shrsi %66, %c13_i32_49 : i32
    %c524287_i32_50 = arith.constant 524287 : i32
    %68 = arith.andi %67, %c524287_i32_50 : i32
    %69 = arith.xori %66, %68 : i32
    %c-1028477387_i32_51 = arith.constant -1028477387 : i32
    %70 = arith.muli %69, %c-1028477387_i32_51 : i32
    %c16_i32_52 = arith.constant 16 : i32
    %71 = arith.shrsi %70, %c16_i32_52 : i32
    %c65535_i32_53 = arith.constant 65535 : i32
    %72 = arith.andi %71, %c65535_i32_53 : i32
    %73 = arith.xori %70, %72 : i32
    %c-1640531527_i32_54 = arith.constant -1640531527 : i32
    %74 = arith.muli %73, %c-1640531527_i32_54 : i32
    %75 = arith.addi %74, %arg0 : i32
    %c16_i32_55 = arith.constant 16 : i32
    %76 = arith.shrsi %75, %c16_i32_55 : i32
    %c65535_i32_56 = arith.constant 65535 : i32
    %77 = arith.andi %76, %c65535_i32_56 : i32
    %78 = arith.xori %75, %77 : i32
    %c-2048144789_i32_57 = arith.constant -2048144789 : i32
    %79 = arith.muli %78, %c-2048144789_i32_57 : i32
    %c13_i32_58 = arith.constant 13 : i32
    %80 = arith.shrsi %79, %c13_i32_58 : i32
    %c524287_i32_59 = arith.constant 524287 : i32
    %81 = arith.andi %80, %c524287_i32_59 : i32
    %82 = arith.xori %79, %81 : i32
    %c-1028477387_i32_60 = arith.constant -1028477387 : i32
    %83 = arith.muli %82, %c-1028477387_i32_60 : i32
    %c16_i32_61 = arith.constant 16 : i32
    %84 = arith.shrsi %83, %c16_i32_61 : i32
    %c65535_i32_62 = arith.constant 65535 : i32
    %85 = arith.andi %84, %c65535_i32_62 : i32
    %86 = arith.xori %83, %85 : i32
    %c-1640531527_i32_63 = arith.constant -1640531527 : i32
    %87 = arith.muli %86, %c-1640531527_i32_63 : i32
    %c-1_i32_64 = arith.constant -1 : i32
    %88 = arith.addi %87, %c-1_i32_64 : i32
    %c16_i32_65 = arith.constant 16 : i32
    %89 = arith.shrsi %88, %c16_i32_65 : i32
    %c65535_i32_66 = arith.constant 65535 : i32
    %90 = arith.andi %89, %c65535_i32_66 : i32
    %91 = arith.xori %88, %90 : i32
    %c-2048144789_i32_67 = arith.constant -2048144789 : i32
    %92 = arith.muli %91, %c-2048144789_i32_67 : i32
    %c13_i32_68 = arith.constant 13 : i32
    %93 = arith.shrsi %92, %c13_i32_68 : i32
    %c524287_i32_69 = arith.constant 524287 : i32
    %94 = arith.andi %93, %c524287_i32_69 : i32
    %95 = arith.xori %92, %94 : i32
    %c-1028477387_i32_70 = arith.constant -1028477387 : i32
    %96 = arith.muli %95, %c-1028477387_i32_70 : i32
    %c16_i32_71 = arith.constant 16 : i32
    %97 = arith.shrsi %96, %c16_i32_71 : i32
    %c65535_i32_72 = arith.constant 65535 : i32
    %98 = arith.andi %97, %c65535_i32_72 : i32
    %99 = arith.xori %96, %98 : i32
    %c-1640531527_i32_73 = arith.constant -1640531527 : i32
    %100 = arith.muli %99, %c-1640531527_i32_73 : i32
    %c1_i32 = arith.constant 1 : i32
    %101 = arith.addi %100, %c1_i32 : i32
    %c16_i32_74 = arith.constant 16 : i32
    %102 = arith.shrsi %101, %c16_i32_74 : i32
    %c65535_i32_75 = arith.constant 65535 : i32
    %103 = arith.andi %102, %c65535_i32_75 : i32
    %104 = arith.xori %101, %103 : i32
    %c-2048144789_i32_76 = arith.constant -2048144789 : i32
    %105 = arith.muli %104, %c-2048144789_i32_76 : i32
    %c13_i32_77 = arith.constant 13 : i32
    %106 = arith.shrsi %105, %c13_i32_77 : i32
    %c524287_i32_78 = arith.constant 524287 : i32
    %107 = arith.andi %106, %c524287_i32_78 : i32
    %108 = arith.xori %105, %107 : i32
    %c-1028477387_i32_79 = arith.constant -1028477387 : i32
    %109 = arith.muli %108, %c-1028477387_i32_79 : i32
    %c16_i32_80 = arith.constant 16 : i32
    %110 = arith.shrsi %109, %c16_i32_80 : i32
    %c65535_i32_81 = arith.constant 65535 : i32
    %111 = arith.andi %110, %c65535_i32_81 : i32
    %112 = arith.xori %109, %111 : i32
    %113 = tpu.iota {dimensions = array<i32: 0>} : vector<3x128xi32>
    %114 = tpu.iota {dimensions = array<i32: 1>} : vector<3x128xi32>
    %c128_i32 = arith.constant 128 : i32
    %115 = vector.broadcast %c128_i32 : i32 to vector<3x128xi32>
    %116 = arith.muli %113, %115 : vector<3x128xi32>
    %117 = arith.addi %116, %114 : vector<3x128xi32>
    %118 = vector.broadcast %60 : i32 to vector<3x128xi32>
    %119 = arith.xori %117, %118 : vector<3x128xi32>
    %c16_i32_82 = arith.constant 16 : i32
    %120 = vector.broadcast %c16_i32_82 : i32 to vector<3x128xi32>
    %121 = arith.shrsi %119, %120 : vector<3x128xi32>
    %c65535_i32_83 = arith.constant 65535 : i32
    %122 = vector.broadcast %c65535_i32_83 : i32 to vector<3x128xi32>
    %123 = arith.andi %121, %122 : vector<3x128xi32>
    %124 = arith.xori %119, %123 : vector<3x128xi32>
    %c-2048144789_i32_84 = arith.constant -2048144789 : i32
    %125 = vector.broadcast %c-2048144789_i32_84 : i32 to vector<3x128xi32>
    %126 = arith.muli %124, %125 : vector<3x128xi32>
    %c13_i32_85 = arith.constant 13 : i32
    %127 = vector.broadcast %c13_i32_85 : i32 to vector<3x128xi32>
    %128 = arith.shrsi %126, %127 : vector<3x128xi32>
    %c524287_i32_86 = arith.constant 524287 : i32
    %129 = vector.broadcast %c524287_i32_86 : i32 to vector<3x128xi32>
    %130 = arith.andi %128, %129 : vector<3x128xi32>
    %131 = arith.xori %126, %130 : vector<3x128xi32>
    %c-1028477387_i32_87 = arith.constant -1028477387 : i32
    %132 = vector.broadcast %c-1028477387_i32_87 : i32 to vector<3x128xi32>
    %133 = arith.muli %131, %132 : vector<3x128xi32>
    %c16_i32_88 = arith.constant 16 : i32
    %134 = vector.broadcast %c16_i32_88 : i32 to vector<3x128xi32>
    %135 = arith.shrsi %133, %134 : vector<3x128xi32>
    %c65535_i32_89 = arith.constant 65535 : i32
    %136 = vector.broadcast %c65535_i32_89 : i32 to vector<3x128xi32>
    %137 = arith.andi %135, %136 : vector<3x128xi32>
    %138 = arith.xori %133, %137 : vector<3x128xi32>
    %139 = vector.broadcast %112 : i32 to vector<3x128xi32>
    %140 = arith.xori %117, %139 : vector<3x128xi32>
    %c16_i32_90 = arith.constant 16 : i32
    %141 = vector.broadcast %c16_i32_90 : i32 to vector<3x128xi32>
    %142 = arith.shrsi %140, %141 : vector<3x128xi32>
    %c65535_i32_91 = arith.constant 65535 : i32
    %143 = vector.broadcast %c65535_i32_91 : i32 to vector<3x128xi32>
    %144 = arith.andi %142, %143 : vector<3x128xi32>
    %145 = arith.xori %140, %144 : vector<3x128xi32>
    %c-2048144789_i32_92 = arith.constant -2048144789 : i32
    %146 = vector.broadcast %c-2048144789_i32_92 : i32 to vector<3x128xi32>
    %147 = arith.muli %145, %146 : vector<3x128xi32>
    %c13_i32_93 = arith.constant 13 : i32
    %148 = vector.broadcast %c13_i32_93 : i32 to vector<3x128xi32>
    %149 = arith.shrsi %147, %148 : vector<3x128xi32>
    %c524287_i32_94 = arith.constant 524287 : i32
    %150 = vector.broadcast %c524287_i32_94 : i32 to vector<3x128xi32>
    %151 = arith.andi %149, %150 : vector<3x128xi32>
    %152 = arith.xori %147, %151 : vector<3x128xi32>
    %c-1028477387_i32_95 = arith.constant -1028477387 : i32
    %153 = vector.broadcast %c-1028477387_i32_95 : i32 to vector<3x128xi32>
    %154 = arith.muli %152, %153 : vector<3x128xi32>
    %c16_i32_96 = arith.constant 16 : i32
    %155 = vector.broadcast %c16_i32_96 : i32 to vector<3x128xi32>
    %156 = arith.shrsi %154, %155 : vector<3x128xi32>
    %c65535_i32_97 = arith.constant 65535 : i32
    %157 = vector.broadcast %c65535_i32_97 : i32 to vector<3x128xi32>
    %158 = arith.andi %156, %157 : vector<3x128xi32>
    %159 = arith.xori %154, %158 : vector<3x128xi32>
    %c9_i32 = arith.constant 9 : i32
    %160 = vector.broadcast %c9_i32 : i32 to vector<3x128xi32>
    %161 = arith.shrsi %138, %160 : vector<3x128xi32>
    %c8388607_i32 = arith.constant 8388607 : i32
    %162 = vector.broadcast %c8388607_i32 : i32 to vector<3x128xi32>
    %163 = arith.andi %161, %162 : vector<3x128xi32>
    %164 = arith.sitofp %163 : vector<3x128xi32> to vector<3x128xf32>
    %cst_98 = arith.constant 1.1920929E-7 : f32
    %165 = vector.broadcast %cst_98 : f32 to vector<3x128xf32>
    %166 = arith.mulf %164, %165 : vector<3x128xf32>
    %c9_i32_99 = arith.constant 9 : i32
    %167 = vector.broadcast %c9_i32_99 : i32 to vector<3x128xi32>
    %168 = arith.shrsi %159, %167 : vector<3x128xi32>
    %c8388607_i32_100 = arith.constant 8388607 : i32
    %169 = vector.broadcast %c8388607_i32_100 : i32 to vector<3x128xi32>
    %170 = arith.andi %168, %169 : vector<3x128xi32>
    %171 = arith.sitofp %170 : vector<3x128xi32> to vector<3x128xf32>
    %cst_101 = arith.constant 1.1920929E-7 : f32
    %172 = vector.broadcast %cst_101 : f32 to vector<3x128xf32>
    %173 = arith.mulf %171, %172 : vector<3x128xf32>
    %cst_102 = arith.constant 1.000000e+00 : f32
    %174 = vector.broadcast %cst_102 : f32 to vector<3x128xf32>
    %175 = arith.subf %174, %166 : vector<3x128xf32>
    %176 = math.log %175 : vector<3x128xf32>
    %cst_103 = arith.constant -2.000000e+00 : f32
    %177 = vector.broadcast %cst_103 : f32 to vector<3x128xf32>
    %178 = arith.mulf %177, %176 : vector<3x128xf32>
    %179 = math.sqrt %178 : vector<3x128xf32>
    %cst_104 = arith.constant 6.28318548 : f32
    %180 = vector.broadcast %cst_104 : f32 to vector<3x128xf32>
    %181 = arith.mulf %180, %173 : vector<3x128xf32>
    %182 = math.cos %181 : vector<3x128xf32>
    %183 = arith.mulf %179, %182 : vector<3x128xf32>
    %c0_i32_105 = arith.constant 0 : i32
    %c7_i32 = arith.constant 7 : i32
    %184 = arith.addi %c0_i32_105, %c7_i32 : i32
    %c1_i32_106 = arith.constant 1 : i32
    %185 = scf.for %arg11 = %c0_i32_105 to %184 step %c1_i32_106 iter_args(%arg12 = %183) -> (vector<3x128xf32>)  : i32 {
      %c4_i32 = arith.constant 4 : i32
      %213 = arith.muli %c4_i32, %arg11 : i32
      %c0_i32_115 = arith.constant 0 : i32
      %214 = arith.addi %213, %c0_i32_115 : i32
      %215 = arith.index_cast %214 : i32 to index
      %216 = memref.load %arg1[%215] : memref<32xf32, #tpu.memory_space<smem>>
      %c4_i32_116 = arith.constant 4 : i32
      %217 = arith.muli %c4_i32_116, %arg11 : i32
      %c1_i32_117 = arith.constant 1 : i32
      %218 = arith.addi %217, %c1_i32_117 : i32
      %219 = arith.index_cast %218 : i32 to index
      %220 = memref.load %arg1[%219] : memref<32xf32, #tpu.memory_space<smem>>
      %c4_i32_118 = arith.constant 4 : i32
      %221 = arith.muli %c4_i32_118, %arg11 : i32
      %c2_i32 = arith.constant 2 : i32
      %222 = arith.addi %221, %c2_i32 : i32
      %223 = arith.index_cast %222 : i32 to index
      %224 = memref.load %arg1[%223] : memref<32xf32, #tpu.memory_space<smem>>
      %c4_i32_119 = arith.constant 4 : i32
      %225 = arith.muli %c4_i32_119, %arg11 : i32
      %c3_i32 = arith.constant 3 : i32
      %226 = arith.addi %225, %c3_i32 : i32
      %227 = arith.index_cast %226 : i32 to index
      %228 = memref.load %arg1[%227] : memref<32xf32, #tpu.memory_space<smem>>
      %229 = arith.truncf %arg12 : vector<3x128xf32> to vector<3x128xbf16>
      %cst_120 = arith.constant dense<0.000000e+00> : vector<32x128xf32>
      %230 = tpu.matmul %1, %229, %cst_120 {dimension_numbers = #tpu.dot_dimension_numbers<[1], [0], [0], [1], [0, 0, 1, 1], [], []>} : vector<32x3xbf16>, vector<3x128xbf16>, vector<32x128xf32> -> vector<32x128xf32>
      %231 = arith.addf %230, %8 : vector<32x128xf32>
      %232 = vector.broadcast %216 : f32 to vector<32x1xf32>
      %233 = arith.mulf %232, %3 : vector<32x1xf32>
      %234 = arith.addf %233, %4 : vector<32x1xf32>
      %235 = vector.broadcast %234 : vector<32x1xf32> to vector<32x128xf32>
      %236 = arith.addf %231, %235 : vector<32x128xf32>
      %cst_121 = arith.constant 0.000000e+00 : f32
      %237 = vector.broadcast %cst_121 : f32 to vector<32x128xf32>
      %238 = arith.maximumf %236, %237 : vector<32x128xf32>
      %239 = arith.truncf %238 : vector<32x128xf32> to vector<32x128xbf16>
      %cst_122 = arith.constant dense<0.000000e+00> : vector<3x128xf32>
      %240 = tpu.matmul %2, %239, %cst_122 {dimension_numbers = #tpu.dot_dimension_numbers<[1], [0], [0], [1], [0, 0, 1, 1], [], []>} : vector<3x32xbf16>, vector<32x128xbf16>, vector<3x128xf32> -> vector<3x128xf32>
      %241 = vector.broadcast %5 : vector<3x1xf32> to vector<3x128xf32>
      %242 = arith.addf %240, %241 : vector<3x128xf32>
      %c0_i32_123 = arith.constant 0 : i32
      %c-1640531527_i32_124 = arith.constant -1640531527 : i32
      %243 = arith.muli %c0_i32_123, %c-1640531527_i32_124 : i32
      %244 = arith.addi %243, %0 : i32
      %c16_i32_125 = arith.constant 16 : i32
      %245 = arith.shrsi %244, %c16_i32_125 : i32
      %c65535_i32_126 = arith.constant 65535 : i32
      %246 = arith.andi %245, %c65535_i32_126 : i32
      %247 = arith.xori %244, %246 : i32
      %c-2048144789_i32_127 = arith.constant -2048144789 : i32
      %248 = arith.muli %247, %c-2048144789_i32_127 : i32
      %c13_i32_128 = arith.constant 13 : i32
      %249 = arith.shrsi %248, %c13_i32_128 : i32
      %c524287_i32_129 = arith.constant 524287 : i32
      %250 = arith.andi %249, %c524287_i32_129 : i32
      %251 = arith.xori %248, %250 : i32
      %c-1028477387_i32_130 = arith.constant -1028477387 : i32
      %252 = arith.muli %251, %c-1028477387_i32_130 : i32
      %c16_i32_131 = arith.constant 16 : i32
      %253 = arith.shrsi %252, %c16_i32_131 : i32
      %c65535_i32_132 = arith.constant 65535 : i32
      %254 = arith.andi %253, %c65535_i32_132 : i32
      %255 = arith.xori %252, %254 : i32
      %c-1640531527_i32_133 = arith.constant -1640531527 : i32
      %256 = arith.muli %255, %c-1640531527_i32_133 : i32
      %257 = arith.addi %256, %arg0 : i32
      %c16_i32_134 = arith.constant 16 : i32
      %258 = arith.shrsi %257, %c16_i32_134 : i32
      %c65535_i32_135 = arith.constant 65535 : i32
      %259 = arith.andi %258, %c65535_i32_135 : i32
      %260 = arith.xori %257, %259 : i32
      %c-2048144789_i32_136 = arith.constant -2048144789 : i32
      %261 = arith.muli %260, %c-2048144789_i32_136 : i32
      %c13_i32_137 = arith.constant 13 : i32
      %262 = arith.shrsi %261, %c13_i32_137 : i32
      %c524287_i32_138 = arith.constant 524287 : i32
      %263 = arith.andi %262, %c524287_i32_138 : i32
      %264 = arith.xori %261, %263 : i32
      %c-1028477387_i32_139 = arith.constant -1028477387 : i32
      %265 = arith.muli %264, %c-1028477387_i32_139 : i32
      %c16_i32_140 = arith.constant 16 : i32
      %266 = arith.shrsi %265, %c16_i32_140 : i32
      %c65535_i32_141 = arith.constant 65535 : i32
      %267 = arith.andi %266, %c65535_i32_141 : i32
      %268 = arith.xori %265, %267 : i32
      %c-1640531527_i32_142 = arith.constant -1640531527 : i32
      %269 = arith.muli %268, %c-1640531527_i32_142 : i32
      %270 = arith.addi %269, %arg11 : i32
      %c16_i32_143 = arith.constant 16 : i32
      %271 = arith.shrsi %270, %c16_i32_143 : i32
      %c65535_i32_144 = arith.constant 65535 : i32
      %272 = arith.andi %271, %c65535_i32_144 : i32
      %273 = arith.xori %270, %272 : i32
      %c-2048144789_i32_145 = arith.constant -2048144789 : i32
      %274 = arith.muli %273, %c-2048144789_i32_145 : i32
      %c13_i32_146 = arith.constant 13 : i32
      %275 = arith.shrsi %274, %c13_i32_146 : i32
      %c524287_i32_147 = arith.constant 524287 : i32
      %276 = arith.andi %275, %c524287_i32_147 : i32
      %277 = arith.xori %274, %276 : i32
      %c-1028477387_i32_148 = arith.constant -1028477387 : i32
      %278 = arith.muli %277, %c-1028477387_i32_148 : i32
      %c16_i32_149 = arith.constant 16 : i32
      %279 = arith.shrsi %278, %c16_i32_149 : i32
      %c65535_i32_150 = arith.constant 65535 : i32
      %280 = arith.andi %279, %c65535_i32_150 : i32
      %281 = arith.xori %278, %280 : i32
      %c-1640531527_i32_151 = arith.constant -1640531527 : i32
      %282 = arith.muli %281, %c-1640531527_i32_151 : i32
      %c2_i32_152 = arith.constant 2 : i32
      %283 = arith.addi %282, %c2_i32_152 : i32
      %c16_i32_153 = arith.constant 16 : i32
      %284 = arith.shrsi %283, %c16_i32_153 : i32
      %c65535_i32_154 = arith.constant 65535 : i32
      %285 = arith.andi %284, %c65535_i32_154 : i32
      %286 = arith.xori %283, %285 : i32
      %c-2048144789_i32_155 = arith.constant -2048144789 : i32
      %287 = arith.muli %286, %c-2048144789_i32_155 : i32
      %c13_i32_156 = arith.constant 13 : i32
      %288 = arith.shrsi %287, %c13_i32_156 : i32
      %c524287_i32_157 = arith.constant 524287 : i32
      %289 = arith.andi %288, %c524287_i32_157 : i32
      %290 = arith.xori %287, %289 : i32
      %c-1028477387_i32_158 = arith.constant -1028477387 : i32
      %291 = arith.muli %290, %c-1028477387_i32_158 : i32
      %c16_i32_159 = arith.constant 16 : i32
      %292 = arith.shrsi %291, %c16_i32_159 : i32
      %c65535_i32_160 = arith.constant 65535 : i32
      %293 = arith.andi %292, %c65535_i32_160 : i32
      %294 = arith.xori %291, %293 : i32
      %c0_i32_161 = arith.constant 0 : i32
      %c-1640531527_i32_162 = arith.constant -1640531527 : i32
      %295 = arith.muli %c0_i32_161, %c-1640531527_i32_162 : i32
      %296 = arith.addi %295, %0 : i32
      %c16_i32_163 = arith.constant 16 : i32
      %297 = arith.shrsi %296, %c16_i32_163 : i32
      %c65535_i32_164 = arith.constant 65535 : i32
      %298 = arith.andi %297, %c65535_i32_164 : i32
      %299 = arith.xori %296, %298 : i32
      %c-2048144789_i32_165 = arith.constant -2048144789 : i32
      %300 = arith.muli %299, %c-2048144789_i32_165 : i32
      %c13_i32_166 = arith.constant 13 : i32
      %301 = arith.shrsi %300, %c13_i32_166 : i32
      %c524287_i32_167 = arith.constant 524287 : i32
      %302 = arith.andi %301, %c524287_i32_167 : i32
      %303 = arith.xori %300, %302 : i32
      %c-1028477387_i32_168 = arith.constant -1028477387 : i32
      %304 = arith.muli %303, %c-1028477387_i32_168 : i32
      %c16_i32_169 = arith.constant 16 : i32
      %305 = arith.shrsi %304, %c16_i32_169 : i32
      %c65535_i32_170 = arith.constant 65535 : i32
      %306 = arith.andi %305, %c65535_i32_170 : i32
      %307 = arith.xori %304, %306 : i32
      %c-1640531527_i32_171 = arith.constant -1640531527 : i32
      %308 = arith.muli %307, %c-1640531527_i32_171 : i32
      %309 = arith.addi %308, %arg0 : i32
      %c16_i32_172 = arith.constant 16 : i32
      %310 = arith.shrsi %309, %c16_i32_172 : i32
      %c65535_i32_173 = arith.constant 65535 : i32
      %311 = arith.andi %310, %c65535_i32_173 : i32
      %312 = arith.xori %309, %311 : i32
      %c-2048144789_i32_174 = arith.constant -2048144789 : i32
      %313 = arith.muli %312, %c-2048144789_i32_174 : i32
      %c13_i32_175 = arith.constant 13 : i32
      %314 = arith.shrsi %313, %c13_i32_175 : i32
      %c524287_i32_176 = arith.constant 524287 : i32
      %315 = arith.andi %314, %c524287_i32_176 : i32
      %316 = arith.xori %313, %315 : i32
      %c-1028477387_i32_177 = arith.constant -1028477387 : i32
      %317 = arith.muli %316, %c-1028477387_i32_177 : i32
      %c16_i32_178 = arith.constant 16 : i32
      %318 = arith.shrsi %317, %c16_i32_178 : i32
      %c65535_i32_179 = arith.constant 65535 : i32
      %319 = arith.andi %318, %c65535_i32_179 : i32
      %320 = arith.xori %317, %319 : i32
      %c-1640531527_i32_180 = arith.constant -1640531527 : i32
      %321 = arith.muli %320, %c-1640531527_i32_180 : i32
      %322 = arith.addi %321, %arg11 : i32
      %c16_i32_181 = arith.constant 16 : i32
      %323 = arith.shrsi %322, %c16_i32_181 : i32
      %c65535_i32_182 = arith.constant 65535 : i32
      %324 = arith.andi %323, %c65535_i32_182 : i32
      %325 = arith.xori %322, %324 : i32
      %c-2048144789_i32_183 = arith.constant -2048144789 : i32
      %326 = arith.muli %325, %c-2048144789_i32_183 : i32
      %c13_i32_184 = arith.constant 13 : i32
      %327 = arith.shrsi %326, %c13_i32_184 : i32
      %c524287_i32_185 = arith.constant 524287 : i32
      %328 = arith.andi %327, %c524287_i32_185 : i32
      %329 = arith.xori %326, %328 : i32
      %c-1028477387_i32_186 = arith.constant -1028477387 : i32
      %330 = arith.muli %329, %c-1028477387_i32_186 : i32
      %c16_i32_187 = arith.constant 16 : i32
      %331 = arith.shrsi %330, %c16_i32_187 : i32
      %c65535_i32_188 = arith.constant 65535 : i32
      %332 = arith.andi %331, %c65535_i32_188 : i32
      %333 = arith.xori %330, %332 : i32
      %c-1640531527_i32_189 = arith.constant -1640531527 : i32
      %334 = arith.muli %333, %c-1640531527_i32_189 : i32
      %c3_i32_190 = arith.constant 3 : i32
      %335 = arith.addi %334, %c3_i32_190 : i32
      %c16_i32_191 = arith.constant 16 : i32
      %336 = arith.shrsi %335, %c16_i32_191 : i32
      %c65535_i32_192 = arith.constant 65535 : i32
      %337 = arith.andi %336, %c65535_i32_192 : i32
      %338 = arith.xori %335, %337 : i32
      %c-2048144789_i32_193 = arith.constant -2048144789 : i32
      %339 = arith.muli %338, %c-2048144789_i32_193 : i32
      %c13_i32_194 = arith.constant 13 : i32
      %340 = arith.shrsi %339, %c13_i32_194 : i32
      %c524287_i32_195 = arith.constant 524287 : i32
      %341 = arith.andi %340, %c524287_i32_195 : i32
      %342 = arith.xori %339, %341 : i32
      %c-1028477387_i32_196 = arith.constant -1028477387 : i32
      %343 = arith.muli %342, %c-1028477387_i32_196 : i32
      %c16_i32_197 = arith.constant 16 : i32
      %344 = arith.shrsi %343, %c16_i32_197 : i32
      %c65535_i32_198 = arith.constant 65535 : i32
      %345 = arith.andi %344, %c65535_i32_198 : i32
      %346 = arith.xori %343, %345 : i32
      %347 = tpu.iota {dimensions = array<i32: 0>} : vector<3x128xi32>
      %348 = tpu.iota {dimensions = array<i32: 1>} : vector<3x128xi32>
      %c128_i32_199 = arith.constant 128 : i32
      %349 = vector.broadcast %c128_i32_199 : i32 to vector<3x128xi32>
      %350 = arith.muli %347, %349 : vector<3x128xi32>
      %351 = arith.addi %350, %348 : vector<3x128xi32>
      %352 = vector.broadcast %294 : i32 to vector<3x128xi32>
      %353 = arith.xori %351, %352 : vector<3x128xi32>
      %c16_i32_200 = arith.constant 16 : i32
      %354 = vector.broadcast %c16_i32_200 : i32 to vector<3x128xi32>
      %355 = arith.shrsi %353, %354 : vector<3x128xi32>
      %c65535_i32_201 = arith.constant 65535 : i32
      %356 = vector.broadcast %c65535_i32_201 : i32 to vector<3x128xi32>
      %357 = arith.andi %355, %356 : vector<3x128xi32>
      %358 = arith.xori %353, %357 : vector<3x128xi32>
      %c-2048144789_i32_202 = arith.constant -2048144789 : i32
      %359 = vector.broadcast %c-2048144789_i32_202 : i32 to vector<3x128xi32>
      %360 = arith.muli %358, %359 : vector<3x128xi32>
      %c13_i32_203 = arith.constant 13 : i32
      %361 = vector.broadcast %c13_i32_203 : i32 to vector<3x128xi32>
      %362 = arith.shrsi %360, %361 : vector<3x128xi32>
      %c524287_i32_204 = arith.constant 524287 : i32
      %363 = vector.broadcast %c524287_i32_204 : i32 to vector<3x128xi32>
      %364 = arith.andi %362, %363 : vector<3x128xi32>
      %365 = arith.xori %360, %364 : vector<3x128xi32>
      %c-1028477387_i32_205 = arith.constant -1028477387 : i32
      %366 = vector.broadcast %c-1028477387_i32_205 : i32 to vector<3x128xi32>
      %367 = arith.muli %365, %366 : vector<3x128xi32>
      %c16_i32_206 = arith.constant 16 : i32
      %368 = vector.broadcast %c16_i32_206 : i32 to vector<3x128xi32>
      %369 = arith.shrsi %367, %368 : vector<3x128xi32>
      %c65535_i32_207 = arith.constant 65535 : i32
      %370 = vector.broadcast %c65535_i32_207 : i32 to vector<3x128xi32>
      %371 = arith.andi %369, %370 : vector<3x128xi32>
      %372 = arith.xori %367, %371 : vector<3x128xi32>
      %373 = vector.broadcast %346 : i32 to vector<3x128xi32>
      %374 = arith.xori %351, %373 : vector<3x128xi32>
      %c16_i32_208 = arith.constant 16 : i32
      %375 = vector.broadcast %c16_i32_208 : i32 to vector<3x128xi32>
      %376 = arith.shrsi %374, %375 : vector<3x128xi32>
      %c65535_i32_209 = arith.constant 65535 : i32
      %377 = vector.broadcast %c65535_i32_209 : i32 to vector<3x128xi32>
      %378 = arith.andi %376, %377 : vector<3x128xi32>
      %379 = arith.xori %374, %378 : vector<3x128xi32>
      %c-2048144789_i32_210 = arith.constant -2048144789 : i32
      %380 = vector.broadcast %c-2048144789_i32_210 : i32 to vector<3x128xi32>
      %381 = arith.muli %379, %380 : vector<3x128xi32>
      %c13_i32_211 = arith.constant 13 : i32
      %382 = vector.broadcast %c13_i32_211 : i32 to vector<3x128xi32>
      %383 = arith.shrsi %381, %382 : vector<3x128xi32>
      %c524287_i32_212 = arith.constant 524287 : i32
      %384 = vector.broadcast %c524287_i32_212 : i32 to vector<3x128xi32>
      %385 = arith.andi %383, %384 : vector<3x128xi32>
      %386 = arith.xori %381, %385 : vector<3x128xi32>
      %c-1028477387_i32_213 = arith.constant -1028477387 : i32
      %387 = vector.broadcast %c-1028477387_i32_213 : i32 to vector<3x128xi32>
      %388 = arith.muli %386, %387 : vector<3x128xi32>
      %c16_i32_214 = arith.constant 16 : i32
      %389 = vector.broadcast %c16_i32_214 : i32 to vector<3x128xi32>
      %390 = arith.shrsi %388, %389 : vector<3x128xi32>
      %c65535_i32_215 = arith.constant 65535 : i32
      %391 = vector.broadcast %c65535_i32_215 : i32 to vector<3x128xi32>
      %392 = arith.andi %390, %391 : vector<3x128xi32>
      %393 = arith.xori %388, %392 : vector<3x128xi32>
      %c9_i32_216 = arith.constant 9 : i32
      %394 = vector.broadcast %c9_i32_216 : i32 to vector<3x128xi32>
      %395 = arith.shrsi %372, %394 : vector<3x128xi32>
      %c8388607_i32_217 = arith.constant 8388607 : i32
      %396 = vector.broadcast %c8388607_i32_217 : i32 to vector<3x128xi32>
      %397 = arith.andi %395, %396 : vector<3x128xi32>
      %398 = arith.sitofp %397 : vector<3x128xi32> to vector<3x128xf32>
      %cst_218 = arith.constant 1.1920929E-7 : f32
      %399 = vector.broadcast %cst_218 : f32 to vector<3x128xf32>
      %400 = arith.mulf %398, %399 : vector<3x128xf32>
      %c9_i32_219 = arith.constant 9 : i32
      %401 = vector.broadcast %c9_i32_219 : i32 to vector<3x128xi32>
      %402 = arith.shrsi %393, %401 : vector<3x128xi32>
      %c8388607_i32_220 = arith.constant 8388607 : i32
      %403 = vector.broadcast %c8388607_i32_220 : i32 to vector<3x128xi32>
      %404 = arith.andi %402, %403 : vector<3x128xi32>
      %405 = arith.sitofp %404 : vector<3x128xi32> to vector<3x128xf32>
      %cst_221 = arith.constant 1.1920929E-7 : f32
      %406 = vector.broadcast %cst_221 : f32 to vector<3x128xf32>
      %407 = arith.mulf %405, %406 : vector<3x128xf32>
      %cst_222 = arith.constant 1.000000e+00 : f32
      %408 = vector.broadcast %cst_222 : f32 to vector<3x128xf32>
      %409 = arith.subf %408, %400 : vector<3x128xf32>
      %410 = math.log %409 : vector<3x128xf32>
      %cst_223 = arith.constant -2.000000e+00 : f32
      %411 = vector.broadcast %cst_223 : f32 to vector<3x128xf32>
      %412 = arith.mulf %411, %410 : vector<3x128xf32>
      %413 = math.sqrt %412 : vector<3x128xf32>
      %cst_224 = arith.constant 6.28318548 : f32
      %414 = vector.broadcast %cst_224 : f32 to vector<3x128xf32>
      %415 = arith.mulf %414, %407 : vector<3x128xf32>
      %416 = math.cos %415 : vector<3x128xf32>
      %417 = arith.mulf %413, %416 : vector<3x128xf32>
      %418 = vector.broadcast %224 : f32 to vector<3x128xf32>
      %419 = arith.mulf %418, %242 : vector<3x128xf32>
      %420 = arith.subf %arg12, %419 : vector<3x128xf32>
      %421 = vector.broadcast %220 : f32 to vector<3x128xf32>
      %422 = arith.mulf %421, %420 : vector<3x128xf32>
      %423 = vector.broadcast %228 : f32 to vector<3x128xf32>
      %424 = arith.mulf %423, %417 : vector<3x128xf32>
      %425 = arith.addf %422, %424 : vector<3x128xf32>
      scf.yield %425 : vector<3x128xf32>
    }
    %c7_i32_107 = arith.constant 7 : i32
    %c28 = arith.constant 28 : index
    %186 = memref.load %arg1[%c28] : memref<32xf32, #tpu.memory_space<smem>>
    %187 = arith.truncf %185 : vector<3x128xf32> to vector<3x128xbf16>
    %cst_108 = arith.constant dense<0.000000e+00> : vector<32x128xf32>
    %188 = tpu.matmul %1, %187, %cst_108 {dimension_numbers = #tpu.dot_dimension_numbers<[1], [0], [0], [1], [0, 0, 1, 1], [], []>} : vector<32x3xbf16>, vector<3x128xbf16>, vector<32x128xf32> -> vector<32x128xf32>
    %189 = arith.addf %188, %8 : vector<32x128xf32>
    %190 = vector.broadcast %186 : f32 to vector<32x1xf32>
    %191 = arith.mulf %190, %3 : vector<32x1xf32>
    %192 = arith.addf %191, %4 : vector<32x1xf32>
    %193 = vector.broadcast %192 : vector<32x1xf32> to vector<32x128xf32>
    %194 = arith.addf %189, %193 : vector<32x128xf32>
    %cst_109 = arith.constant 0.000000e+00 : f32
    %195 = vector.broadcast %cst_109 : f32 to vector<32x128xf32>
    %196 = arith.maximumf %194, %195 : vector<32x128xf32>
    %197 = arith.truncf %196 : vector<32x128xf32> to vector<32x128xbf16>
    %cst_110 = arith.constant dense<0.000000e+00> : vector<3x128xf32>
    %198 = tpu.matmul %2, %197, %cst_110 {dimension_numbers = #tpu.dot_dimension_numbers<[1], [0], [0], [1], [0, 0, 1, 1], [], []>} : vector<3x32xbf16>, vector<32x128xbf16>, vector<3x128xf32> -> vector<3x128xf32>
    %199 = vector.broadcast %5 : vector<3x1xf32> to vector<3x128xf32>
    %200 = arith.addf %198, %199 : vector<3x128xf32>
    %c29 = arith.constant 29 : index
    %201 = memref.load %arg1[%c29] : memref<32xf32, #tpu.memory_space<smem>>
    %c30 = arith.constant 30 : index
    %202 = memref.load %arg1[%c30] : memref<32xf32, #tpu.memory_space<smem>>
    %203 = vector.broadcast %202 : f32 to vector<3x128xf32>
    %204 = arith.mulf %203, %200 : vector<3x128xf32>
    %205 = arith.subf %185, %204 : vector<3x128xf32>
    %206 = vector.broadcast %201 : f32 to vector<3x128xf32>
    %207 = arith.mulf %206, %205 : vector<3x128xf32>
    %cst_111 = arith.constant 1.000000e+00 : f32
    %208 = vector.broadcast %cst_111 : f32 to vector<3x128xf32>
    %209 = arith.addf %207, %208 : vector<3x128xf32>
    %cst_112 = arith.constant 5.000000e-01 : f32
    %210 = vector.broadcast %cst_112 : f32 to vector<3x128xf32>
    %211 = arith.mulf %209, %210 : vector<3x128xf32>
    %c0_113 = arith.constant 0 : index
    %c0_114 = arith.constant 0 : index
    %212 = vector.load %arg10[%c0_113, %c0_114] : memref<3x128xf32, #tpu.memory_space<vmem>>, vector<3x128xf32>
    tpu.vector_store %arg10[%c0_113, %c0_114], %211 {strides = array<i32>} : memref<3x128xf32, #tpu.memory_space<vmem>>, vector<3x128xf32>,
    return
  }
  func.func @transform_0(%arg0: i32) -> i32 {
    %c0_i32 = arith.constant 0 : i32
    %c0_i32_0 = arith.constant 0 : i32
    return %c0_i32 : i32
  }
  func.func @transform_1(%arg0: i32) -> i32 {
    %c0_i32 = arith.constant 0 : i32
    %c0_i32_0 = arith.constant 0 : i32
    return %c0_i32 : i32
  }
  func.func @transform_2(%arg0: i32) -> (i32, i32) {
    %c0_i32 = arith.constant 0 : i32
    %c0_i32_0 = arith.constant 0 : i32
    return %c0_i32, %arg0 : i32, i32
  }
  func.func @transform_3(%arg0: i32) -> (i32, i32) {
    %c0_i32 = arith.constant 0 : i32
    %c0_i32_0 = arith.constant 0 : i32
    %c0_i32_1 = arith.constant 0 : i32
    return %c0_i32, %c0_i32_0 : i32, i32
  }
  func.func @transform_4(%arg0: i32) -> (i32, i32) {
    %c0_i32 = arith.constant 0 : i32
    %c0_i32_0 = arith.constant 0 : i32
    %c0_i32_1 = arith.constant 0 : i32
    return %c0_i32, %c0_i32_0 : i32, i32
  }
  func.func @transform_5(%arg0: i32) -> (i32, i32) {
    %c0_i32 = arith.constant 0 : i32
    %c0_i32_0 = arith.constant 0 : i32
    %c0_i32_1 = arith.constant 0 : i32
    return %c0_i32, %c0_i32_0 : i32, i32
  }
  func.func @transform_6(%arg0: i32) -> (i32, i32) {
    %c0_i32 = arith.constant 0 : i32
    %c0_i32_0 = arith.constant 0 : i32
    %c0_i32_1 = arith.constant 0 : i32
    return %c0_i32, %c0_i32_0 : i32, i32
  }
  func.func @transform_7(%arg0: i32) -> (i32, i32) {
    %c0_i32 = arith.constant 0 : i32
    %c0_i32_0 = arith.constant 0 : i32
    %c0_i32_1 = arith.constant 0 : i32
    return %c0_i32, %c0_i32_0 : i32, i32
  }
  func.func @transform_8(%arg0: i32) -> (i32, i32) {
    %c0_i32 = arith.constant 0 : i32
    %c0_i32_0 = arith.constant 0 : i32
    %c0_i32_1 = arith.constant 0 : i32
    return %c0_i32, %c0_i32_0 : i32, i32
  }
  func.func @transform_9(%arg0: i32) -> (i32, i32) {
    %c0_i32 = arith.constant 0 : i32
    %c0_i32_0 = arith.constant 0 : i32
    return %c0_i32, %arg0 : i32, i32
  }
}

</mosaic_0001>

<bundles_post_ra>
// kernel: conditional_diffusion_forward.1
= control target key start
LH: loop header
LB: loop body
LE: loop exit
PB: predicated region body
PF: predicated region fallthrough
CT: control target
= control target key end

     0   :  { %15 = vsyncpa [#allocation4], 0  ;;  %s1417_s0 = inlined_call_operand.vmem [shape: f32[32], index: 0, kind: input, shape index: {}]   ;;  %s1418_s1 = inlined_call_operand.<no memory space> [shape: s32[1], index: 1, kind: input, shape index: {}]   ;;  %s1419_s2 = inlined_call_operand.vmem [shape: bf16[3,128], index: 2, kind: input, shape index: {}]   ;;  %s1420_s3 = inlined_call_operand.vmem [shape: bf16[32,3], index: 3, kind: input, shape index: {}]   ;;  %s1421_s4 = inlined_call_operand.vmem [shape: bf16[32,3], index: 4, kind: input, shape index: {}]   ;;  %s1422_s5 = inlined_call_operand.vmem [shape: f32[32,1], index: 5, kind: input, shape index: {}]   ;;  %s1423_s6 = inlined_call_operand.vmem [shape: f32[32,1], index: 6, kind: input, shape index: {}]   ;;  %s1424_s7 = inlined_call_operand.vmem [shape: bf16[3,32], index: 7, kind: input, shape index: {}]   ;;  %s1425_s8 = inlined_call_operand.vmem [shape: f32[3,1], index: 8, kind: input, shape index: {}]   ;;  %s1426_s9 = inlined_call_operand.vmem [shape: f32[3,128], index: 9, kind: output, shape index: {}]  }
   0x1   :  { %s22_s11 = sshll.u32 %s1417_s0, 4  ;;  %s23_s11 = int_to_ptr.vmem [resolvable:$true] %s22_s11 }
   0x2   :  { %s1062_s12 = scalar_lea.vmem %s23_s11, 16  ;;  %p1067_p1 = scmp.lt.s32.totalorder %s23_s11, %s23_s11 }
   0x3   :  { %p1063_p0 = scmp.ne.s32.totalorder %s23_s11, %s1062_s12  ;;  %p1068_p2 = scmp.lt.s32.totalorder %s1062_s12, %s1062_s12 }
   0x5   :  { %p1069_p3 = por %p1068_p2, %p1067_p1 }
   0x7   :  { %p1070_p4 = pnand %p1069_p3, %p1063_p0 }
   0x9   :  { %1073 = shalt.err (!%p1070_p4)
}
   0xa   :  { %s1092_s13 = smov [#allocation3]  }
   0xb   :  { %25 = dma.vmem_to_smem %s23_s11, 16, %s1092_s13, [#allocation4]  }
   0xc   :  { %1082 = dma.done.wait [#allocation4], 16  }
   0xd   :  { %1083 = vsyncadd [#allocation4], 4294967280 }
   0xe   :  { %45 = sfence }
   0xf   :  { %v1168_v0 = vld [vmem:[%s1420_s3] sm:$0xf]  ;;  %v1173_v1 = vld [vmem:[%s1420_s3 + $0x4] sm:$0xf]  ;;  %v1178_v2 = vld [vmem:[%s1420_s3 + $0x8] sm:$0xf]  ;;  %v201_v21 = vlaneseq }
  0x10   :  { %v1183_v3 = vld [vmem:[%s1420_s3 + $0xc] sm:$0xf]  ;;  %v1188_v4 = vld [vmem:[%s1424_s7] sm:$0x3]  ;;  %vm84_vm0 = vcmask 1040384   ;;  %v1203_v7 = vld [vmem:[%s1422_s5 + $0x10] sm:$0xff] }
  0x11   :  { %v1193_v5 = vld [vmem:[%s1422_s5] sm:$0xff]  ;;  %v1198_v6 = vld [vmem:[%s1422_s5 + $0x8] sm:$0xff]  ;;  %v1208_v8 = vld [vmem:[%s1422_s5 + $0x18] sm:$0xff]  ;;  %vm85_vm1 = vcmask 1041408   ;;  %v1093_v12 = vmov 65535   ;;  %vm77_vm2 = vcmask 23552  }
  0x12   :  { %v1213_v9 = vld [vmem:[%s1423_s6] sm:$0xff]  ;;  %v1218_v10 = vld [vmem:[%s1423_s6 + $0x8] sm:$0xff]  ;;  %v1223_v11 = vld [vmem:[%s1423_s6 + $0x10] sm:$0xff]  ;;  %v86_v13 = vsel %vm84_vm0, 4294967295, %v1093_v12  ;;  %s140_s15 = sshra.s32 %s1418_s1, 16  ;;  %v202_v22 = vshrl.u32 %v201_v21, 7 }
  0x13   :  { %v1231_v14 = vld [vmem:[%s1423_s6 + $0x18] sm:$0xff]  ;;  %v1236_v15 = vld [vmem:[%s1425_s8] sm:$0x7]  ;;  %v1241_v17 = vsel %vm85_vm1, %v86_v13, 0  ;;  %s141_s23 = sand.u32 65535, %s140_s15  ;;  %v1041_v20 = vld [vmem:[%s1421_s4 + $0x8] sm:$0xff]  }
  0x14   :  { %v66_v16 = vld [vmem:[%s1419_s2] sm:$0x3]  ;;  %s142_s25 = sxor.u32 %s141_s23, %s1418_s1  ;;  %v204_v23 = vand.u32 127, %v201_v21  ;;  %v205_v24 = vmul.u32 128, %v202_v22  ;;  %v1094_v59 = vmov 683565275  }
  0x15   :  { %v89_v18 = vand.u32 %v1241_v17, %v66_v16  ;;  %v1040_v19 = vld [vmem:[%s1421_s4] sm:$0xff]   ;;  %s143_s2 = smul.u32 2246822507, %s142_s25  ;;  %v1095_v61 = vmov 2475754826  }
  0x16   :  { %964 = vmatprep.mubr.msk.bf16.mxu0 %vm77_vm2, %v1040_v19  ;;  %v1258_v25 = vadd.s32 %v205_v24, %v204_v23  ;;  %v1096_v63 = vmov 2131351028   ;;  %v1097_v16 = vmov 2102212464   ;;  %v1098_v22 = vmov 920167782  }
  0x17   :  { %962 = vmatprep.subr.bf16.mxu0 %v89_v18  ;;  %s144_s27 = sshra.s32 %s143_s2, 13 }
  0x18   :  { %963 = vmatpush3.bf16.msra.mxu0 %v89_v18  ;;  %s145_s28 = sand.u32 524287, %s144_s27 }
  0x19   :  { %s146_s3 = sxor.u32 %s145_s28, %s143_s2 }
  0x1a   :  { %s147_s29 = smul.u32 3266489909, %s146_s3 }
  0x1b   :  { %965 = vmatmul.mubr.msk.bf16.vlgmr.msra.gmra.mxu0 %vm77_vm2, %v1041_v20 }
  0x1c   :  { %s148_s7 = sshra.s32 %s147_s29, 16 }
  0x1d   :  { %s149_s30 = sand.u32 65535, %s148_s7 }
  0x1e   :  { %s150_s10 = sxor.u32 %s149_s30, %s147_s29 }
  0x1f   :  { %s151_s11 = smul.u32 2654435769, %s150_s10 }
  0x21   :  { %s153_s1 = sshra.s32 %s151_s11, 16 }
  0x22   :  { %s154_s12 = sand.u32 65535, %s153_s1 }
  0x23   :  { %s155_s13 = sxor.u32 %s154_s12, %s151_s11 }
  0x24   :  { %s156_s5 = smul.u32 2246822507, %s155_s13 }
  0x26   :  { %s157_s14 = sshra.s32 %s156_s5, 13 }
  0x27   :  { %s158_s15 = sand.u32 524287, %s157_s14 }
  0x28   :  { %s159_s16 = sxor.u32 %s158_s15, %s156_s5 }
  0x29   :  { %s160_s4 = smul.u32 3266489909, %s159_s16 }
  0x2b   :  { %s161_s0 = sshra.s32 %s160_s4, 16 }
  0x2c   :  { %s162_s17 = sand.u32 65535, %s161_s0 }
  0x2d   :  { %s163_s18 = sxor.u32 %s162_s17, %s160_s4 }
  0x2e   :  { %s1255_s19 = smul.u32 2654435769, %s163_s18 }
  0x30   :  { %s165_s20 = sadd.s32 4294967295, %s1255_s19 }
  0x31   :  { %s166_s21 = sshra.s32 %s165_s20, 16 }
  0x32   :  { %s167_s22 = sand.u32 65535, %s166_s21 }
  0x33   :  { %s168_s23 = sxor.u32 %s167_s22, %s165_s20 }
  0x34   :  { %s169_s6 = smul.u32 2246822507, %s168_s23 }
  0x36   :  { %s170_s24 = sshra.s32 %s169_s6, 13 }
  0x37   :  { %s171_s25 = sand.u32 524287, %s170_s24 }
  0x38   :  { %s172_s8 = sxor.u32 %s171_s25, %s169_s6 }
  0x39   :  { %s173_s26 = smul.u32 3266489909, %s172_s8  ;;  %s1296_s8 = smov 0  }
  0x3b   :  { %s174_s2 = sshra.s32 %s173_s26, 16 }
  0x3c   :  { %s175_s27 = sand.u32 65535, %s174_s2 }
  0x3d   :  { %s176_s28 = sxor.u32 %s175_s27, %s173_s26 }
  0x3e   :  { %s177_s3 = smul.u32 2654435769, %s176_s28 }
  0x40   :  { %s178_s29 = sshra.s32 %s177_s3, 16  ;;  %s189_s7 = sadd.s32 1, %s177_s3 }
  0x41   :  { %s179_s30 = sand.u32 65535, %s178_s29  ;;  %s190_s10 = sshra.s32 %s189_s7, 16 }
  0x42   :  { %s180_s11 = sxor.u32 %s179_s30, %s177_s3  ;;  %s191_s1 = sand.u32 65535, %s190_s10 }
  0x43   :  { %s181_s12 = smul.u32 2246822507, %s180_s11  ;;  %s192_s13 = sxor.u32 %s191_s1, %s189_s7 }
  0x44   :  { %s193_s5 = smul.u32 2246822507, %s192_s13 }
  0x45   :  { %s182_s14 = sshra.s32 %s181_s12, 13 }
  0x46   :  { %s183_s15 = sand.u32 524287, %s182_s14  ;;  %s194_s16 = sshra.s32 %s193_s5, 13 }
  0x47   :  { %s184_s4 = sxor.u32 %s183_s15, %s181_s12  ;;  %s195_s0 = sand.u32 524287, %s194_s16 }
  0x48   :  { %s185_s17 = smul.u32 3266489909, %s184_s4  ;;  %s196_s18 = sxor.u32 %s195_s0, %s193_s5 }
  0x49   :  { %s197_s20 = smul.u32 3266489909, %s196_s18 }
  0x4a   :  { %s186_s22 = sshra.s32 %s185_s17, 16 }
  0x4b   :  { %s198_s21 = sshra.s32 %s197_s20, 16  ;;  %s187_s24 = sand.u32 65535, %s186_s22 }
  0x4c   :  { %s199_s23 = sand.u32 65535, %s198_s21  ;;  %s188_s25 = sxor.u32 %s187_s24, %s185_s17 }
  0x4d   :  { %s200_s6 = sxor.u32 %s199_s23, %s197_s20  ;;  %v207_v30 = vstv %s188_s25 }
  0x4e   :  { %v220_v26 = vstv %s200_s6  ;;  %v208_v33 = vxor.u32 %v207_v30, %v1258_v25 }
  0x4f   :  { %v221_v27 = vxor.u32 %v220_v26, %v1258_v25 }
  0x50   :  { %v909_v36 = vshrl.u32 %v208_v33, 16 }
  0x51   :  { %v912_v28 = vshrl.u32 %v221_v27, 16 }
  0x52   :  { %v211_v39 = vxor.u32 %v909_v36, %v208_v33 }
  0x53   :  { %v224_v29 = vxor.u32 %v912_v28, %v221_v27  ;;  %v1099_v28 = vmov 1326507024  }
  0x54   :  { %v212_v42 = vmul.u32 2246822507, %v211_v39 }
  0x55   :  { %v225_v31 = vmul.u32 2246822507, %v224_v29 }
  0x56   :  { %v910_v45 = vshrl.u32 %v212_v42, 13 }
  0x57   :  { %v913_v32 = vshrl.u32 %v225_v31, 13 }
  0x58   :  { %v215_v48 = vxor.u32 %v910_v45, %v212_v42 }
  0x59   :  { %v228_v34 = vxor.u32 %v913_v32, %v225_v31 }
  0x5a   :  { %v216_v52 = vmul.u32 3266489909, %v215_v48 }
  0x5b   :  { %v229_v35 = vmul.u32 3266489909, %v228_v34 }
  0x5c   :  { %v911_v56 = vshrl.u32 %v216_v52, 16 }
  0x5d   :  { %v914_v37 = vshrl.u32 %v229_v35, 16 }
  0x5e   :  { %v219_v24 = vxor.u32 %v911_v56, %v216_v52 }
  0x5f   :  { %v232_v38 = vxor.u32 %v914_v37, %v229_v35 }
  0x61   :  { %v916_v40 = vshrl.u32 %v232_v38, 9 }
  0x63   :  { %v239_v41 = vcvt.s32.f32 %v916_v40  ;;  %v915_v40 = vshrl.u32 %v219_v24, 9 }
  0x65   :  { %v240_v43 = vmul.f32 1.1920929e-07, %v239_v41 }
  0x67   :  { %v1262_v44 = vmul.f32 6.2831855, %v240_v43 }
  0x69   :  { %v256_v46 = vand.u32 2139095040, %v1262_v44  ;;  %v253_v50 = vand.u32 2147483647, %v1262_v44  ;;  %vm255_vm10 = vcmp.lt.s32.totalorder %v1262_v44, 0  ;;  %vm345_vm1 = vweird.f32 %v1262_v44 }
  0x6b   :  { %v257_v47 = vshrl.u32 %v256_v46, 23  ;;  %v260_v53 = vand.u32 8388607, %v253_v50  ;;  %vm254_vm11 = vcmp.le.f32.partialorder %v253_v50, 0.7853982 }
  0x6d   :  { %v917_v49 = vadd.s32 4294967169, %v257_v47  ;;  %v261_v13 = vor.u32 8388608, %v260_v53 }
  0x6f   :  { %v263_v51 = vadd.s32 1, %v917_v49  ;;  %v301_v33 = vshll.u32 %v261_v13, 8 }
  0x71   :  { %vm264_vm3 = vcmp.gt.s32.totalorder %v263_v51, 0 }
  0x72   :  { %v265_v54 = vsel %vm264_vm3, %v263_v51, 0 }
  0x73   :  { %v267_v55 = vand.u32 31, %v265_v54  ;;  %v266_v57 = vshrl.u32 %v265_v54, 5 }
  0x75   :  { %v268_v58 = vsub.s32 32, %v267_v55  ;;  %v270_v60 = vshll.u32 %v1094_v59, %v267_v55  ;;  %v273_v62 = vshll.u32 %v1095_v61, %v267_v55  ;;  %v276_v12 = vshll.u32 %v1096_v63, %v267_v55 }
  0x76   :  { %v279_v18 = vshll.u32 %v1097_v16, %v267_v55  ;;  %v282_v23 = vshll.u32 %v1098_v22, %v267_v55  ;;  %vm285_vm4 = vcmp.lt.s32.totalorder %v266_v57, 1  ;;  %vm286_vm5 = vcmp.lt.s32.totalorder %v266_v57, 2 }
  0x77   :  { %v271_v19 = vshrl.u32 %v1095_v61, %v268_v58  ;;  %v274_v20 = vshrl.u32 %v1096_v63, %v268_v58  ;;  %v277_v21 = vshrl.u32 %v1097_v16, %v268_v58  ;;  %v269_v26 = vshrl.u32 %v1094_v59, %v268_v58 }
  0x78   :  { %v280_v27 = vshrl.u32 %v1098_v22, %v268_v58  ;;  %v283_v29 = vshrl.u32 %v1099_v28, %v268_v58  ;;  %vm287_vm6 = vcmp.lt.s32.totalorder %v266_v57, 3  ;;  %vm288_vm7 = vcmp.lt.s32.totalorder %v266_v57, 4 }
  0x79   :  { %v272_v30 = vor.u32 %v271_v19, %v270_v60  ;;  %v275_v31 = vor.u32 %v274_v20, %v273_v62  ;;  %v278_v32 = vor.u32 %v277_v21, %v276_v12  ;;  %v235_v55 = vcvt.s32.f32 %v915_v40 }
  0x7a   :  { %v281_v34 = vor.u32 %v280_v27, %v279_v18  ;;  %v284_v35 = vor.u32 %v283_v29, %v282_v23 }
  0x7b   :  { %v289_v36 = vsel %vm285_vm4, %v269_v26, %v272_v30  ;;  %v290_v37 = vsel %vm288_vm7, %v278_v32, 2102212464  ;;  %v293_v38 = vsel %vm285_vm4, %v272_v30, %v275_v31  ;;  %v297_v39 = vsel %vm285_vm4, %v275_v31, %v278_v32 }
  0x7c   :  { %v291_v41 = vsel %vm287_vm6, %v275_v31, %v290_v37  ;;  %v294_v42 = vsel %vm288_vm7, %v281_v34, 920167782  ;;  %v298_v43 = vsel %vm288_vm7, %v284_v35, 1326507024  ;;  %v236_v59 = vmul.f32 1.1920929e-07, %v235_v55 }
  0x7d   :  { %v295_v45 = vsel %vm287_vm6, %v278_v32, %v294_v42  ;;  %v299_v46 = vsel %vm287_vm6, %v281_v34, %v298_v43  ;;  %v292_v47 = vsel %vm286_vm5, %v289_v36, %v291_v41 }
  0x7e   :  { %v296_v48 = vsel %vm286_vm5, %v293_v38, %v295_v45  ;;  %v300_v49 = vsel %vm286_vm5, %v297_v39, %v299_v46  ;;  %v308_v56 = vmul.u32 %v301_v33, %v292_v47  ;;  %v241_v62 = vsub.f32 1.0, %v236_v59 }
  0x7f   :  { %v1271_v51 = vmul.u32.u64.low %v301_v33, %v300_v49  ;;  %v1272_v52 = vmul.u32.u64.high %v301_v33, %v300_v49, %v1271_v51  ;;  %v1274_v53 = vmul.u32.u64.low %v301_v33, %v296_v48  ;;  %v1275_v54 = vmul.u32.u64.high %v301_v33, %v296_v48, %v1274_v53 }
  0x80   :  { %1042 = vlog2.f32 %v241_v62 }
  0x81   :  { %vm310_vm8 = vc.u32 %v1272_v52, %v1274_v53  ;;  %v311_v58 = vadd.s32 1, %v1275_v54  ;;  %v309_v21 = vadd.s32 %v1274_v53, %v1272_v52 }
  0x83   :  { %v312_v60 = vsel %vm310_vm8, %v311_v58, %v1275_v54 }
  0x84   :  { %v313_v61 = vadd.s32 %v312_v60, %v308_v56 }
  0x86   :  { %v314_v63 = vadd.s32 536870912, %v313_v61 }
  0x88   :  { %v315_v57 = vshrl.u32 %v314_v63, 30 }
  0x8a   :  { %v316_v12 = vshll.u32 %v315_v57, 30  ;;  %v339_v40 = vsub.s32 4, %v315_v57 }
  0x8c   :  { %v317_v13 = vsub.s32 %v313_v61, %v316_v12  ;;  %v340_v42 = vsel %vm255_vm10, %v339_v40, %v315_v57 }
  0x8d   :  { %v1043_v22 = vpop.eup %1042  ;;  %v342_v43 = vsel %vm254_vm11, 0, %v340_v42 }
  0x8e   :  { %v319_v16 = vsub.s32 0, %v317_v13  ;;  %v243_v28 = vmul.f32 0.6931472, %v1043_v22  ;;  %v346_v46 = vand.u32 3, %v342_v43 }
  0x90   :  { %v918_v18 = vmin.u32 %v319_v16, %v317_v13  ;;  %v244_v33 = vmul.f32 -2.0, %v243_v28  ;;  %vm351_vm13 = vcmp.eq.s32.totalorder %v346_v46, 2  ;;  %vm348_vm15 = vcmp.eq.s32.totalorder %v346_v46, 0 }
  0x91   :  { %vm347_vm0 = vcmp.lt.s32.totalorder %v346_v46, 2 }
  0x92   :  { %v321_v19 = vclz %v918_v18  ;;  %1044 = vrsqrt.f32 %v244_v33  ;;  %vm247_vm12 = vcmp.eq.f32.partialorder %v244_v33, inf  ;;  %v250_v49 = vand.u32 2147483648, %v244_v33 }
  0x93   :  { %vm249_vm14 = vcmp.eq.f32.partialorder %v244_v33, 0.0 }
  0x94   :  { %v919_v20 = vadd.s32 4294967294, %v321_v19 }
  0x96   :  { %vm920_vm9 = vcmp.lt.s32.totalorder %v919_v20, 0 }
  0x97   :  { %v324_v23 = vsel %vm920_vm9, 0, %v919_v20 }
  0x98   :  { %v325_v24 = vsub.s32 32, %v324_v23  ;;  %v326_v26 = vshll.u32 %v317_v13, %v324_v23  ;;  %v329_v27 = vsub.s32 4294967266, %v324_v23 }
  0x9a   :  { %v327_v29 = vshrl.u32 %v309_v21, %v325_v24  ;;  %v330_v30 = vadd.s32 127, %v329_v27 }
  0x9c   :  { %v328_v31 = vor.u32 %v327_v29, %v326_v26  ;;  %v331_v32 = vshll.u32 %v330_v30, 23 }
  0x9e   :  { %v332_v34 = vor.u32 4788187, %v331_v32  ;;  %v335_v35 = vcvt.s32.f32 %v328_v31 }
  0x9f   :  { %v1045_v45 = vpop.eup %1044 }
  0xa0   :  { %v333_v36 = vand.u32 2147483647, %v332_v34  ;;  %v246_v47 = vmul.f32 %v1045_v45, %v244_v33 }
  0xa2   :  { %v336_v37 = vmul.f32 %v335_v35, %v333_v36  ;;  %v248_v52 = vsel %vm247_vm12, %v244_v33, %v246_v47 }
  0xa3   :  { %v251_v55 = vsel %vm249_vm14, %v250_v49, %v248_v52 }
  0xa4   :  { %v337_v38 = vxor.u32 2147483648, %v336_v37 }
  0xa6   :  { %v338_v39 = vsel %vm255_vm10, %v337_v38, %v336_v37 }
  0xa7   :  { %v341_v41 = vsel %vm254_vm11, %v1262_v44, %v338_v39 }
  0xa8   :  { %1046 = vcosq.f32 %v341_v41 }
  0xa9   :  { %1048 = vsinq.f32 %v341_v41 }
  0xb5   :  { %v1047_v48 = vpop.eup %1046 }
  0xb6   :  { %v1049_v51 = vpop.eup %1048  ;;  %v352_v50 = vxor.u32 2147483648, %v1047_v48 }
  0xb7   :  { %v349_v53 = vxor.u32 2147483648, %v1049_v51 }
  0xb8   :  { %v353_v54 = vsel %vm351_vm13, %v352_v50, %v1049_v51 }
  0xb9   :  { %v350_v56 = vsel %vm348_vm15, %v1047_v48, %v349_v53 }
  0xba   :  { %v354_v58 = vsel %vm347_vm0, %v350_v56, %v353_v54 }
  0xbb   :  { %v355_v59 = vsel %vm345_vm1, nan, %v354_v58 }
  0xbc   :  { %v356_v60 = vmul.f32 %v355_v59, %v251_v55  }
  0xdb   :  { %v1286_v61 = vpop.f32.mrf.mxu0 }
  0xdd   :  { %v1288_v62 = vpop.f32.mrf.mxu0 }
  0xdf   :  { %v1290_v63 = vpop.f32.mrf.mxu0 }
  0xe1   :  { %v1292_v57 = vpop.f32.mrf.mxu0 }
  0xe2 LB: > { %v1306_v44 = vcombine.low %v1168_v0, %v1173_v1  ;;  %v1100_v12 = vmov 0   ;;  %v372_v13 = vpack.c.bf16 %v1086_v60, %v1086_v60  ;;  %s1313_s26 = sshll.u32 %s1090_s8, 2  ;;  %v1319_v18 = vcombine.low %v1178_v2, %v1183_v3  ;;  %s529_s27 = sadd.s32 %s1090_s8, %s1255_s19  ;;  %s1090_s8 = sphi %s1296_s8, %s362_s8   ;;  %v1086_v60 = vphi %v356_v60, %v1428_v60  }
  0xe3   : > { %1050 = vset.pattern.permute.xlu0 %v1100_v12  ;;  %1051 = vset.pattern.permute.xlu1 %v1100_v12  ;;  %s365_s2 = sld [smem:[#allocation3 + %s1313_s26]]  ;;  %v1101_v29 = vmov 0.0   ;;  %vm1102_vm3 = vmmov 0   ;;  %s530_s28 = sshra.s32 %s529_s27, 16  ;;  %vm485_vm4 = vcmask 261120  }
  0xe4   : > { %970 = vmatprep.mubr.msk.bf16.mxu0 %vm77_vm2, %v1306_v44  ;;  %v390_v16 = vand.u32 %v372_v13, %v1241_v17  ;;  %974 = vmatprep.subr.bf16.mxu1 %v1101_v29  ;;  %s531_s3 = sand.u32 65535, %s530_s28  ;;  %s362_s8 = sadd.s32 1, %s1090_s8  }
  0xe5   : > { %978 = vmatprep.mubr.msk.bf16.mxu1 %vm1102_vm3, %v1101_v29  ;;  %s532_s29 = sxor.u32 %s531_s3, %s529_s27  ;;  %p359_p5 = scmp.ge.s32.totalorder %s362_s8, 7  }
  0xe6   : > { %968 = vmatprep.subr.bf16.mxu0 %v390_v16  ;;  %s533_s7 = smul.u32 2246822507, %s532_s29  ;;  %s946_s19 = sld [smem:[#allocation3 + $0x1e]] (%p359_p5) }
  0xe7   : > { %969 = vmatpush3.bf16.msra.mxu0 %v390_v16  ;;  %s945_s8 = sld [smem:[#allocation3 + $0x1d]] (%p359_p5) }
  0xe8   : > { %s534_s30 = sshra.s32 %s533_s7, 13 }
  0xe9   : > { %v441_v19 = vstv %s365_s2  ;;  %s535_s10 = sand.u32 524287, %s534_s30 }
  0xea   : > { %971 = vmatmul.mubr.msk.bf16.vlgmr.msra.gmra.mxu0 %vm77_vm2, %v1319_v18  ;;  %v444_v20 = vmul.f32 %v441_v19, %v1203_v7  ;;  %v445_v21 = vmul.f32 %v441_v19, %v1208_v8  ;;  %v442_v22 = vmul.f32 %v441_v19, %v1193_v5  ;;  %v443_v23 = vmul.f32 %v441_v19, %v1198_v6  ;;  %s536_s11 = sxor.u32 %s535_s10, %s533_s7 }
  0xeb   : > { %s537_s1 = smul.u32 3266489909, %s536_s11  ;;  %984 = vmatprep.mubr.msk.bf16.mxu0 (%p359_p5), %vm77_vm2, %v1306_v44 }
  0xec   : > { %v448_v24 = vadd.f32 %v444_v20, %v1223_v11  ;;  %v446_v26 = vadd.f32 %v442_v22, %v1213_v9  ;;  %v449_v27 = vadd.f32 %v445_v21, %v1231_v14  ;;  %v447_v28 = vadd.f32 %v443_v23, %v1218_v10 }
  0xed   : > { %s538_s12 = sshra.s32 %s537_s1, 16 }
  0xee   : > { %462 = vperm.xlu0 %1050, %v448_v24   ;;  %452 = vperm.xlu1 %1051, %v446_v26   ;;  %s539_s13 = sand.u32 65535, %s538_s12 }
  0xef   : > { %s540_s5 = sxor.u32 %s539_s13, %s537_s1  ;;  %s368_s13 = sadd.s32 2, %s1313_s26 }
  0xf0   : > { %s1334_s14 = smul.u32 2654435769, %s540_s5  ;;  %s370_s5 = sadd.s32 3, %s1313_s26 }
  0xf2   : > { %467 = vperm.xlu0 %1050, %v449_v27   ;;  %457 = vperm.xlu1 %1051, %v447_v28   ;;  %s554_s15 = sadd.s32 3, %s1334_s14  ;;  %s542_s25 = sadd.s32 2, %s1334_s14 }
  0xf3   : > { %s555_s16 = sshra.s32 %s554_s15, 16  ;;  %s543_s2 = sshra.s32 %s542_s25, 16 }
  0xf4   : > { %s556_s4 = sand.u32 65535, %s555_s16  ;;  %s544_s27 = sand.u32 65535, %s543_s2 }
  0xf5   : > { %s557_s0 = sxor.u32 %s556_s4, %s554_s15  ;;  %s545_s28 = sxor.u32 %s544_s27, %s542_s25 }
  0xf6   : > { %482 = vperm.xlu0 %1050, %v1236_v15   ;;  %s558_s17 = smul.u32 2246822507, %s557_s0  ;;  %s369_s14 = sld [smem:[#allocation3 + %s368_s13]] }
  0xf7   : > { %s546_s3 = smul.u32 2246822507, %s545_s28  ;;  %s366_s15 = sadd.s32 1, %s1313_s26 }
  0xf8   : > { %s559_s18 = sshra.s32 %s558_s17, 13  ;;  %s371_s16 = sld [smem:[#allocation3 + %s370_s5]] }
  0xf9   : > { %s560_s20 = sand.u32 524287, %s559_s18  ;;  %s547_s29 = sshra.s32 %s546_s3, 13 }
  0xfa   : > { %s561_s21 = sxor.u32 %s560_s20, %s558_s17  ;;  %s548_s7 = sand.u32 524287, %s547_s29 }
  0xfb   : > { %s562_s22 = smul.u32 3266489909, %s561_s21  ;;  %s549_s30 = sxor.u32 %s548_s7, %s546_s3 }
  0xfc   : > { %s550_s10 = smul.u32 3266489909, %s549_s30  ;;  %s367_s4 = sld [smem:[#allocation3 + %s366_s15]] }
  0xfd   : > { %s563_s23 = sshra.s32 %s562_s22, 16  ;;  %s939_s26 = sld [smem:[#allocation3 + $0x1c]] (%p359_p5) }
  0xfe   : > { %s564_s6 = sand.u32 65535, %s563_s23  ;;  %s551_s11 = sshra.s32 %s550_s10, 16 }
  0xff   : > { %s565_s24 = sxor.u32 %s564_s6, %s562_s22  ;;  %s552_s1 = sand.u32 65535, %s551_s11 }
 0x100   : > { %v579_v30 = vstv %s565_s24  ;;  %s553_s12 = sxor.u32 %s552_s1, %s550_s10 }
 0x101   : > { %v580_v31 = vxor.u32 %v579_v30, %v1258_v25 }
 0x103   : > { %v930_v32 = vshrl.u32 %v580_v31, 16 }
 0x105   : > { %v583_v33 = vxor.u32 %v930_v32, %v580_v31  ;;  %v1103_v32 = vmov 2102212464  }
 0x107   : > { %v584_v39 = vmul.u32 2246822507, %v583_v33 }
 0x109   : > { %v931_v49 = vshrl.u32 %v584_v39, 13 }
 0x10b   : > { %v587_v59 = vxor.u32 %v931_v49, %v584_v39  ;;  %v1105_v39 = vmov 1326507024  }
 0x10d   : > { %v588_v13 = vmul.u32 3266489909, %v587_v59 }
 0x10f   : > { %v932_v16 = vshrl.u32 %v588_v13, 16 }
 0x111   : > { %v591_v19 = vxor.u32 %v932_v16, %v588_v13 }
 0x113   : > { %v934_v20 = vshrl.u32 %v591_v19, 9 }
 0x115   : > { %v598_v21 = vcvt.s32.f32 %v934_v20 }
 0x117   : > { %v599_v22 = vmul.f32 1.1920929e-07, %v598_v21 }
 0x119   : > { %v1344_v23 = vmul.f32 6.2831855, %v599_v22 }
 0x11b   : > { %v615_v24 = vand.u32 2139095040, %v1344_v23  ;;  %vm614_vm12 = vcmp.lt.s32.totalorder %v1344_v23, 0 }
 0x11d   : > { %v616_v26 = vshrl.u32 %v615_v24, 23 }
 0x11f   : > { %v935_v27 = vadd.s32 4294967169, %v616_v26 }
 0x121   : > { %v622_v28 = vadd.s32 1, %v935_v27 }
 0x123   : > { %vm623_vm5 = vcmp.gt.s32.totalorder %v622_v28, 0 }
 0x169   : > { %v463_v34 = vpop.permute.xlu0 %462  ;;  %v453_v37 = vpop.permute.xlu1 %452 }
 0x16d   : > { %v468_v45 = vpop.permute.xlu0 %467  ;;  %v458_v51 = vpop.permute.xlu1 %457 }
 0x1aa   : > { %v972_v35 = vpop.f32.mrf.mxu0 }
 0x1ab   : > { %v435_v36 = vadd.f32 %v972_v35, %v1286_v61 }
 0x1ac   : > { %v426_v38 = vpop.f32.mrf.mxu0 }
 0x1ad   : > { %v472_v41 = vadd.f32 %v463_v34, %v435_v36  ;;  %v427_v42 = vadd.f32 %v426_v38, %v1288_v62  ;;  %v1104_v34 = vmov 920167782   ;;  %v612_v36 = vand.u32 2147483647, %v1344_v23 }
 0x1ae   : > { %v973_v40 = vpop.f32.mrf.mxu0 }
 0x1af   : > { %v438_v43 = vadd.f32 %v973_v40, %v1290_v63  ;;  %v476_v52 = vmax.f32 %v472_v41, 0.0  ;;  %v470_v50 = vadd.f32 %v453_v37, %v427_v42  ;;  %v1106_v41 = vmov 683565275  }
 0x1b0   : > { %v429_v46 = vpop.f32.mrf.mxu0  ;;  %vm613_vm13 = vcmp.le.f32.partialorder %v612_v36, 0.7853982 }
 0x1b1   : > { %v473_v47 = vadd.f32 %v468_v45, %v438_v43  ;;  %v430_v48 = vadd.f32 %v429_v46, %v1292_v57  ;;  %v474_v58 = vmax.f32 %v470_v50, 0.0  ;;  %v1107_v43 = vmov 2475754826  }
 0x1b2   : > { %v619_v50 = vand.u32 8388607, %v612_v36 }
 0x1b3   : > { %v477_v53 = vmax.f32 %v473_v47, 0.0  ;;  %v471_v54 = vadd.f32 %v458_v51, %v430_v48  ;;  %v1108_v47 = vmov 2131351028  }
 0x1b4   : > { %v620_v59 = vor.u32 8388608, %v619_v50 }
 0x1b5   : > { %v475_v55 = vmax.f32 %v471_v54, 0.0  ;;  %v479_v56 = vpack.c.bf16 %v477_v53, %v476_v52 }
 0x1b6   : > { %v660_v21 = vshll.u32 %v620_v59, 8 }
 0x1b7   : > { %975 = vmatpush3.bf16.msra.mxu1 %v479_v56  ;;  %v478_v12 = vpack.c.bf16 %v475_v55, %v474_v58 }
 0x1b8   : > { %976 = vmatprep.subr.bf16.mxu1 %v1101_v29  ;;  %v624_v29 = vsel %vm623_vm5, %v622_v28, 0  ;;  %vm704_vm5 = vweird.f32 %v1344_v23 }
 0x1b9   : > { %v626_v30 = vand.u32 31, %v624_v29  ;;  %v625_v37 = vshrl.u32 %v624_v29, 5 }
 0x1bb   : > { %977 = vmatpush3.bf16.msra.mxu1 %v478_v12  ;;  %v627_v31 = vsub.s32 32, %v626_v30  ;;  %v638_v33 = vshll.u32 %v1103_v32, %v626_v30  ;;  %v641_v38 = vshll.u32 %v1104_v34, %v626_v30  ;;  %v629_v42 = vshll.u32 %v1106_v41, %v626_v30 }
 0x1bc   : > { %v632_v46 = vshll.u32 %v1107_v43, %v626_v30  ;;  %v635_v49 = vshll.u32 %v1108_v47, %v626_v30  ;;  %vm647_vm6 = vcmp.lt.s32.totalorder %v625_v37, 4  ;;  %vm644_vm7 = vcmp.lt.s32.totalorder %v625_v37, 1 }
 0x1bd   : > { %v639_v35 = vshrl.u32 %v1104_v34, %v627_v31  ;;  %v642_v40 = vshrl.u32 %v1105_v39, %v627_v31  ;;  %v630_v45 = vshrl.u32 %v1107_v43, %v627_v31  ;;  %v633_v48 = vshrl.u32 %v1108_v47, %v627_v31 }
 0x1be   : > { %979 = vmatmul.mubr.msk.bf16.vlgmr.msra.gmra.mxu1 %vm485_vm4, %v1188_v4  ;;  %v636_v51 = vshrl.u32 %v1103_v32, %v627_v31  ;;  %vm646_vm8 = vcmp.lt.s32.totalorder %v625_v37, 3  ;;  %vm645_vm9 = vcmp.lt.s32.totalorder %v625_v37, 2  ;;  %v628_v28 = vshrl.u32 %v1106_v41, %v627_v31 }
 0x1bf   : > { %v640_v52 = vor.u32 %v639_v35, %v638_v33  ;;  %v643_v53 = vor.u32 %v642_v40, %v641_v38  ;;  %v631_v54 = vor.u32 %v630_v45, %v629_v42  ;;  %v634_v55 = vor.u32 %v633_v48, %v632_v46 }
 0x1c0   : > { %v637_v56 = vor.u32 %v636_v51, %v635_v49  ;;  %v566_v41 = vstv %s553_s12 }
 0x1c1   : > { %v653_v58 = vsel %vm647_vm6, %v640_v52, 920167782  ;;  %v657_v12 = vsel %vm647_vm6, %v643_v53, 1326507024  ;;  %v652_v13 = vsel %vm644_vm7, %v631_v54, %v634_v55  ;;  %v648_v33 = vsel %vm644_vm7, %v628_v28, %v631_v54 }
 0x1c2   : > { %v654_v16 = vsel %vm646_vm8, %v637_v56, %v653_v58  ;;  %v656_v19 = vsel %vm644_vm7, %v634_v55, %v637_v56  ;;  %v658_v20 = vsel %vm646_vm8, %v640_v52, %v657_v12  ;;  %v649_v32 = vsel %vm647_vm6, %v637_v56, 2102212464 }
 0x1c3   : > { %v655_v22 = vsel %vm645_vm9, %v652_v13, %v654_v16  ;;  %v659_v24 = vsel %vm645_vm9, %v656_v19, %v658_v20  ;;  %v650_v34 = vsel %vm646_vm8, %v634_v55, %v649_v32  ;;  %v567_v42 = vxor.u32 %v566_v41, %v1258_v25 }
 0x1c4   : > { %v1359_v26 = vmul.u32.u64.low %v660_v21, %v655_v22  ;;  %v1360_v27 = vmul.u32.u64.high %v660_v21, %v655_v22, %v1359_v26  ;;  %v1362_v29 = vmul.u32.u64.low %v660_v21, %v659_v24  ;;  %v1363_v30 = vmul.u32.u64.high %v660_v21, %v659_v24, %v1362_v29 }
 0x1c5   : > { %v651_v35 = vsel %vm645_vm9, %v648_v33, %v650_v34  ;;  %v927_v45 = vshrl.u32 %v567_v42, 16  ;;  %vm1111_vm6 = vmmov (%p359_p5), 0  }
 0x1c6   : > { %v670_v38 = vadd.s32 1, %v1360_v27  ;;  %vm669_vm10 = vc.u32 %v1363_v30, %v1359_v26  ;;  %v667_v39 = vmul.u32 %v660_v21, %v651_v35  ;;  %v668_v20 = vadd.s32 %v1359_v26, %v1363_v30 }
 0x1c7   : > { %v570_v47 = vxor.u32 %v927_v45, %v567_v42 }
 0x1c8   : > { %v671_v31 = vsel %vm669_vm10, %v670_v38, %v1360_v27 }
 0x1c9   : > { %v672_v40 = vadd.s32 %v671_v31, %v667_v39  ;;  %v571_v37 = vmul.u32 2246822507, %v570_v47 }
 0x1cb   : > { %v673_v43 = vadd.s32 536870912, %v672_v40  ;;  %v928_v51 = vshrl.u32 %v571_v37, 13 }
 0x1cd   : > { %v674_v46 = vshrl.u32 %v673_v43, 30  ;;  %v574_v50 = vxor.u32 %v928_v51, %v571_v37 }
 0x1cf   : > { %v675_v48 = vshll.u32 %v674_v46, 30  ;;  %v575_v54 = vmul.u32 3266489909, %v574_v50  ;;  %v698_v43 = vsub.s32 4, %v674_v46 }
 0x1d1   : > { %v676_v49 = vsub.s32 %v672_v40, %v675_v48  ;;  %v929_v56 = vshrl.u32 %v575_v54, 16  ;;  %v699_v45 = vsel %vm614_vm12, %v698_v43, %v674_v46 }
 0x1d2   : > { %v701_v47 = vsel %vm613_vm13, 0, %v699_v45 }
 0x1d3   : > { %v678_v52 = vsub.s32 0, %v676_v49  ;;  %v578_v59 = vxor.u32 %v929_v56, %v575_v54 }
 0x1d5   : > { %v936_v53 = vmin.u32 %v678_v52, %v676_v49  ;;  %v933_v13 = vshrl.u32 %v578_v59, 9 }
 0x1d7   : > { %v680_v55 = vclz %v936_v53  ;;  %v594_v19 = vcvt.s32.f32 %v933_v13 }
 0x1d9   : > { %v937_v58 = vadd.s32 4294967294, %v680_v55  ;;  %v595_v24 = vmul.f32 1.1920929e-07, %v594_v19 }
 0x1db   : > { %vm938_vm11 = vcmp.lt.s32.totalorder %v937_v58, 0  ;;  %v600_v32 = vsub.f32 1.0, %v595_v24 }
 0x1dc   : > { %v683_v12 = vsel %vm938_vm11, 0, %v937_v58 }
 0x1dd   : > { %v688_v16 = vsub.s32 4294967266, %v683_v12  ;;  %v684_v21 = vsub.s32 32, %v683_v12  ;;  %v685_v27 = vshll.u32 %v676_v49, %v683_v12  ;;  %1052 = vlog2.f32 %v600_v32  ;;  %v483_v12 = vpop.permute.xlu0 %482 }
 0x1de   : > { %v705_v49 = vand.u32 3, %v701_v47 }
 0x1df   : > { %v689_v22 = vadd.s32 127, %v688_v16  ;;  %v686_v28 = vshrl.u32 %v668_v20, %v684_v21  ;;  %v716_v16 = vstv %s369_s14  ;;  %v721_v21 = vstv %s371_s16 }
 0x1e0   : > { %vm707_vm14 = vcmp.eq.s32.totalorder %v705_v49, 0  ;;  %vm710_vm15 = vcmp.eq.s32.totalorder %v705_v49, 2  ;;  %vm706_vm1 = vcmp.lt.s32.totalorder %v705_v49, 2 }
 0x1e1   : > { %v690_v29 = vshll.u32 %v689_v22, 23  ;;  %v687_v33 = vor.u32 %v686_v28, %v685_v27  ;;  %v719_v27 = vstv %s367_s4 }
 0x1e3   : > { %v691_v34 = vor.u32 4788187, %v690_v29  ;;  %v694_v38 = vcvt.s32.f32 %v687_v33 }
 0x1e5   : > { %v692_v35 = vand.u32 2147483647, %v691_v34 }
 0x1e7   : > { %v695_v39 = vmul.f32 %v694_v38, %v692_v35  ;;  %v1109_v38 = vmov (%p359_p5), 0  }
 0x1e8   :  { %1060 = vset.pattern.permute.xlu0 (%p359_p5), %v1109_v38  ;;  %1061 = vset.pattern.permute.xlu1 (%p359_p5), %v1109_v38 }
 0x1e9   : > { %v696_v31 = vxor.u32 2147483648, %v695_v39 }
 0x1ea   : > { %v1053_v40 = vpop.eup %1052 }
 0x1eb   : > { %v697_v26 = vsel %vm614_vm12, %v696_v31, %v695_v39  ;;  %v602_v30 = vmul.f32 0.6931472, %v1053_v40  ;;  %v794_v39 = vstv (%p359_p5), %s939_s26 }
 0x1ec   : > { %v700_v41 = vsel %vm613_vm13, %v1344_v23, %v697_v26  ;;  %v797_v31 = vmul.f32 (%p359_p5), %v794_v39, %v1203_v7  ;;  %v798_v40 = vmul.f32 (%p359_p5), %v794_v39, %v1208_v8  ;;  %v795_v0 = vmul.f32 (%p359_p5), %v794_v39, %v1193_v5 }
 0x1ed   : > { %v603_v42 = vmul.f32 -2.0, %v602_v30  ;;  %1054 = vcosq.f32 %v700_v41  ;;  %v796_v1 = vmul.f32 (%p359_p5), %v794_v39, %v1198_v6  ;;  %v1110_v5 = vmov (%p359_p5), 0.0  }
 0x1ee   : > { %1056 = vsinq.f32 %v700_v41  ;;  %v801_v2 = vadd.f32 (%p359_p5), %v797_v31, %v1223_v11  ;;  %v799_v3 = vadd.f32 (%p359_p5), %v795_v0, %v1213_v9  ;;  %988 = vmatprep.subr.bf16.mxu1 (%p359_p5), %v1110_v5  ;;  %992 = vmatprep.mubr.msk.bf16.mxu1 (%p359_p5), %vm1111_vm6, %v1110_v5 }
 0x1ef   : > { %1058 = vrsqrt.f32 %v603_v42  ;;  %vm606_vm0 = vcmp.eq.f32.partialorder %v603_v42, inf  ;;  %v609_v46 = vand.u32 2147483648, %v603_v42  ;;  %vm608_vm3 = vcmp.eq.f32.partialorder %v603_v42, 0.0 }
 0x1f0   :  { %815 = vperm.xlu0 (%p359_p5), %1060, %v801_v2   ;;  %805 = vperm.xlu1 (%p359_p5), %1061, %v799_v3   ;;  %v800_v25 = vadd.f32 (%p359_p5), %v796_v1, %v1218_v10 }
 0x1f4   :  { %810 = vperm.xlu1 (%p359_p5), %1061, %v800_v25  }
 0x1fa   : > { %v1055_v48 = vpop.eup %1054 }
 0x1fb   : > { %v1057_v37 = vpop.eup %1056  ;;  %v711_v36 = vxor.u32 2147483648, %v1055_v48 }
 0x1fc   : > { %v1059_v51 = vpop.eup %1058  ;;  %v708_v52 = vxor.u32 2147483648, %v1057_v37 }
 0x1fd   : > { %v605_v50 = vmul.f32 %v1059_v51, %v603_v42  ;;  %v712_v54 = vsel %vm710_vm15, %v711_v36, %v1057_v37 }
 0x1fe   : > { %v709_v53 = vsel %vm707_vm14, %v1055_v48, %v708_v52 }
 0x1ff   : > { %v607_v55 = vsel %vm606_vm0, %v603_v42, %v605_v50  ;;  %v713_v56 = vsel %vm706_vm1, %v709_v53, %v712_v54  ;;  %v887_v53 = vstv (%p359_p5), %s945_s8 }
 0x200   : > { %v610_v58 = vsel %vm608_vm3, %v609_v46, %v607_v55  ;;  %v714_v59 = vsel %vm704_vm5, nan, %v713_v56 }
 0x201   : > { %v715_v20 = vmul.f32 %v714_v59, %v610_v58 }
 0x203   : > { %v722_v32 = vmul.f32 %v721_v21, %v715_v20 }
 0x26b   :  { %v816_v6 = vpop.permute.xlu0 (%p359_p5), %815  ;;  %v806_v9 = vpop.permute.xlu1 (%p359_p5), %805 }
 0x26f   :  { %v811_v42 = vpop.permute.xlu1 (%p359_p5), %810 }
 0x27e   : > { %v523_v13 = vpop.f32.mrf.mxu1 }
 0x27f   : > { %v524_v19 = vadd.f32 %v523_v13, %v483_v12 }
 0x280   : > { %v980_v22 = vpop.f32.mrf.mxu1 }
 0x281   : > { %v717_v24 = vmul.f32 %v716_v16, %v524_v19 }
 0x282   : > { %v526_v28 = vpop.f32.mrf.mxu1 }
 0x283   : > { %v718_v29 = vsub.f32 %v1086_v60, %v717_v24 }
 0x284   : > { %v981_v33 = vpop.f32.mrf.mxu1 }
 0x285   : > { %v720_v34 = vmul.f32 %v719_v27, %v718_v29 }
 0x286   :  { %361 = sbr.rel (!%p359_p5) target bundleno = 226 (0xe2), region = 67 }
 0x287   : > { %v1383_v60 = vadd.f32 %v722_v32, %v720_v34  }
 0x289   : > { %v1427_v23 = vmov %v1383_v60 }
 0x28a   : > { %v1428_v60 = vmov %v1427_v23  ;;  %v725_v35 = vpack.c.bf16 (%p359_p5), %v1427_v23, %v1427_v23 }
 0x28c   :  { %v743_v60 = vand.u32 %v725_v35, %v1241_v17  ;;  %v802_v17 = vadd.f32 %v798_v40, %v1231_v14 }
 0x28e   :  { %982 = vmatprep.subr.bf16.mxu0 %v743_v60  ;;  %820 = vperm.xlu0 %1060, %v802_v17  }
 0x28f   :  { %983 = vmatpush3.bf16.msra.mxu0 %v743_v60 }
 0x292   :  { %985 = vmatmul.mubr.msk.bf16.vlgmr.msra.gmra.mxu0 %vm77_vm2, %v1319_v18  ;;  %835 = vperm.xlu0 %1060, %v1236_v15  }
 0x309   :  { %v821_v26 = vpop.permute.xlu0 %820 }
 0x352   :  { %v986_v7 = vpop.f32.mrf.mxu0 }
 0x353   :  { %v788_v8 = vadd.f32 %v986_v7, %v1286_v61 }
 0x354   :  { %v779_v11 = vpop.f32.mrf.mxu0 }
 0x355   :  { %v825_v18 = vadd.f32 %v816_v6, %v788_v8  ;;  %v780_v14 = vadd.f32 %v779_v11, %v1288_v62  ;;  %v836_v62 = vpop.permute.xlu0 %835 }
 0x356   :  { %v987_v44 = vpop.f32.mrf.mxu0 }
 0x357   :  { %v791_v10 = vadd.f32 %v987_v44, %v1290_v63  ;;  %v829_v43 = vmax.f32 %v825_v18, 0.0  ;;  %v823_v45 = vadd.f32 %v806_v9, %v780_v14 }
 0x358   :  { %v782_v30 = vpop.f32.mrf.mxu0 }
 0x359   :  { %v826_v41 = vadd.f32 %v821_v26, %v791_v10  ;;  %v783_v15 = vadd.f32 %v782_v30, %v1292_v57  ;;  %v827_v49 = vmax.f32 %v823_v45, 0.0  ;;  %v884_v57 = vstv %s946_s19 }
 0x35b   :  { %v830_v47 = vmax.f32 %v826_v41, 0.0  ;;  %v824_v48 = vadd.f32 %v811_v42, %v783_v15 }
 0x35d   :  { %v828_v37 = vmax.f32 %v824_v48, 0.0  ;;  %v832_v61 = vpack.c.bf16 %v830_v47, %v829_v43 }
 0x35f   :  { %989 = vmatpush3.bf16.msra.mxu1 %v832_v61  ;;  %v831_v51 = vpack.c.bf16 %v828_v37, %v827_v49 }
 0x360   :  { %990 = vmatprep.subr.bf16.mxu1 %v1110_v5 }
 0x363   :  { %991 = vmatpush3.bf16.msra.mxu1 %v831_v51 }
 0x366   :  { %993 = vmatmul.mubr.msk.bf16.vlgmr.msra.gmra.mxu1 %vm485_vm4, %v1188_v4 }
 0x426   :  { %v876_v63 = vpop.f32.mrf.mxu1 }
 0x427   :  { %v877_v52 = vadd.f32 %v876_v63, %v836_v62 }
 0x428   :  { %v994_v36 = vpop.f32.mrf.mxu1 }
 0x429   :  { %v885_v50 = vmul.f32 %v884_v57, %v877_v52 }
 0x42a   :  { %v879_v54 = vpop.f32.mrf.mxu1 }
 0x42b   :  { %v886_v46 = vsub.f32 %v1427_v23, %v885_v50 }
 0x42c   :  { %v995_v55 = vpop.f32.mrf.mxu1 }
 0x42d   :  { %v888_v56 = vmul.f32 %v887_v53, %v886_v46 }
 0x42f   :  { %v889_v58 = vadd.f32 1.0, %v888_v56 }
 0x431   :  { %v890_v59 = vmul.f32 0.5, %v889_v58 }
 0x433   :  { %891 = vst [vmem:[%s1426_s9] sm:$0x7] %v890_v59 }
 0x434   :  { %896 = vsyncpa [#allocation4], 1 }

</bundles_post_ra>
